<compile_context>
chip_gen: v7x
topology: tpu7x:2x2x1
jax: 0.10.0
libtpu: 0.0.40
codegen_flags: <defaults>
</compile_context>

<pallas_src>
import functools

import jax
import jax.numpy as jnp
from jax.experimental import pallas as pl
from jax.experimental.pallas import tpu as pltpu


_LARGE = 1e10            # sentinel squared-ish feature value for masked-out negatives
_SPAT_SENTINEL = -1e10   # pc2 value for padded candidate columns -> always fails the radius test


def _round_up(x, m):
    return ((x + m - 1) // m) * m


def _hardest_contrastive_kernel(pos_margin, neg_margin, m_actual, tile_m,
                                af0_ref, am0_ref, cf1t_ref, cp1t_ref,
                                af1_ref, am1_ref, cf0t_ref, cp0t_ref,
                                out_ref,
                                min0_ref, min1_ref):
    i = pl.program_id(0)          # anchor tile (parallel)
    k = pl.program_id(1)          # candidate tile (arbitrary / reduction)
    nk = pl.num_programs(1)

    @pl.when(k == 0)
    def _init():
        min0_ref[...] = jnp.full_like(min0_ref, _LARGE)
        min1_ref[...] = jnp.full_like(min1_ref, _LARGE)

    def _side(af_ref, am_ref, cft_ref, cpt_ref, min_ref):
        # augmented feature matmul (bf16 inputs, f32 acc): result = c2 - 2 * a.c
        af = af_ref[...]                                                    # (TM, Ca) f32
        feat_val = jnp.dot(af.astype(jnp.bfloat16), cft_ref[...],
                           preferred_element_type=jnp.float32)              # (TM, TK)

        # augmented spatial matmul (f32, contraction 8): result = pc2 - 2 * pa.pc
        am = am_ref[...]                                                    # (TM, 8) f32
        spat_val = jnp.dot(am, cpt_ref[...],
                           preferred_element_type=jnp.float32)              # (TM, TK)

        thr = am[:, 4:5]                                                    # neg_r2 - pa2, (TM, 1)
        masked = jnp.where(spat_val > thr, feat_val, _LARGE)                # 1 cmp + 1 sel / elem

        # lane-dense running min: VPU mins over 128-lane groups, no per-k XLU reduce
        tk = masked.shape[-1]
        run = masked[:, :128]
        for g in range(1, tk // 128):
            run = jnp.minimum(run, masked[:, g * 128:(g + 1) * 128])
        min_ref[...] = jnp.minimum(min_ref[...], run)

    # side 0: cloud-0 anchor features vs cloud-1 candidates (mask in cloud-1 space)
    _side(af0_ref, am0_ref, cf1t_ref, cp1t_ref, min0_ref)
    # side 1: cloud-1 anchor features vs cloud-0 candidates (mask in cloud-0 space)
    _side(af1_ref, am1_ref, cf0t_ref, cp0t_ref, min1_ref)

    @pl.when(k == nk - 1)
    def _finalize():
        rows = jax.lax.broadcasted_iota(jnp.int32, (tile_m, 1), 0) + i * tile_m
        row_valid = rows < m_actual                                         # (TM, 1)

        # positive term: anchor feats are stored as [-2*f, 1, 0...], so ||diff|| = 2*||f0-f1||
        d = af0_ref[...] - af1_ref[...]
        pos_d = 0.5 * jnp.sqrt(jnp.sum(d * d, axis=-1, keepdims=True))      # (TM, 1)
        pos_per = jnp.where(row_valid, jnp.maximum(pos_d - pos_margin, 0.0) ** 2, 0.0)
        pos_sum = jnp.sum(pos_per, axis=0, keepdims=True)                   # (1, 1)

        # negative terms: single cross-lane min, add back a2, sqrt after min
        def _neg_sum(min_ref, am_ref):
            a2 = am_ref[...][:, 5:6]                                        # ||f_anchor||^2 (f32)
            hard_sq = jnp.min(min_ref[...], axis=-1, keepdims=True) + a2    # (TM, 1)
            hard = jnp.sqrt(jnp.maximum(hard_sq, 0.0))
            per = jnp.where(row_valid, jnp.maximum(neg_margin - hard, 0.0) ** 2, 0.0)
            return jnp.sum(per, axis=0, keepdims=True)                      # (1, 1)

        neg0_sum = _neg_sum(min0_ref, am0_ref)
        neg1_sum = _neg_sum(min1_ref, am1_ref)

        # lane-dense (3, 128) partial-sum slab for this anchor tile
        slab = jnp.concatenate(
            [jnp.broadcast_to(pos_sum, (1, 128)),
             jnp.broadcast_to(neg0_sum, (1, 128)),
             jnp.broadcast_to(neg1_sum, (1, 128))], axis=0)
        out_ref[0] = slab


class HardestContrastiveLossGpu:
    def __init__(self, pos_radius, neg_radius, pos_margin, neg_margin,
                 max_correspondence, num_candidate, tile_m=256, tile_k=1024):
        self.pos_radius = pos_radius          # used upstream for correspondence generation
        self.neg_radius = float(neg_radius)
        self.pos_margin = float(pos_margin)
        self.neg_margin = float(neg_margin)
        self.max_correspondence = max_correspondence
        self.num_candidate = num_candidate
        self.tile_m = tile_m
        self.tile_k = tile_k

    def __call__(self, points0, points1, feats0, feats1, correspondences):
        # deterministic sampling (glue, plain JAX): first K correspondences / candidates
        corr = correspondences[: self.max_correspondence]
        idx0 = corr[:, 0]
        idx1 = corr[:, 1]

        f32 = jnp.float32
        af0 = feats0[idx0].astype(f32)        # (M, C)
        af1 = feats1[idx1].astype(f32)
        ap0 = points0[idx0].astype(f32)       # (M, 3)
        ap1 = points1[idx1].astype(f32)
        cf0 = feats0[: self.num_candidate].astype(f32)   # (K, C)
        cf1 = feats1[: self.num_candidate].astype(f32)
        cp0 = points0[: self.num_candidate].astype(f32)  # (K, 3)
        cp1 = points1[: self.num_candidate].astype(f32)

        m = af0.shape[0]
        kc = cf0.shape[0]
        c = feats0.shape[-1]
        ca = _round_up(c + 1, 16)             # augmented contraction dim (bf16-tile friendly)
        neg_r2 = self.neg_radius ** 2

        tm = min(self.tile_m, _round_up(m, 8))
        # v7x: guarantee >= 2 parallel anchor tiles so both TensorCores get work
        if _round_up(m, tm) // tm < 2 and m > 8:
            tm = _round_up((m + 1) // 2, 8)
        tk = min(self.tile_k, _round_up(kc, 128))
        m_pad = _round_up(m, tm)
        k_pad = _round_up(kc, tk)

        # ---- augmented anchor feature arrays: [-2*f, 1, 0...]  (f32; cast to bf16 in-kernel)
        def build_anchor_feat(f):
            arr = jnp.zeros((m_pad, ca), f32)
            arr = arr.at[:m, :c].set(-2.0 * f)
            arr = arr.at[:m, c].set(1.0)
            return arr

        # ---- augmented anchor meta arrays: [-2*p, 1, thr, a2, 0, 0]
        #      thr = neg_r2 - ||p||^2 ; a2 = ||f_anchor||^2 of that side's feature
        def build_anchor_meta(p_anchor, f_for_a2):
            thr = neg_r2 - jnp.sum(p_anchor * p_anchor, axis=-1, keepdims=True)
            a2 = jnp.sum(f_for_a2 * f_for_a2, axis=-1, keepdims=True)
            meta = jnp.concatenate(
                [-2.0 * p_anchor, jnp.ones((m, 1), f32), thr, a2, jnp.zeros((m, 2), f32)],
                axis=-1)                                                    # (M, 8)
            return jnp.pad(meta, ((0, m_pad - m), (0, 0)))

        # ---- augmented candidate feature arrays (transposed, bf16): [f ; ||f||^2 ; 0...]
        def build_cand_feat_t(cf):
            c2 = jnp.sum(cf * cf, axis=-1)
            arr = jnp.zeros((ca, k_pad), f32)
            arr = arr.at[:c, :kc].set(cf.T)
            arr = arr.at[c, :kc].set(c2)
            return arr.astype(jnp.bfloat16)

        # ---- augmented candidate point arrays (transposed, f32): [p ; ||p||^2 ; 0...]
        #      padded columns get pc2 = -1e10 so they always fail the radius test.
        def build_cand_pt_t(cp):
            pc2 = jnp.sum(cp * cp, axis=-1)
            arr = jnp.zeros((8, k_pad), f32)
            arr = arr.at[:3, :kc].set(cp.T)
            arr = arr.at[3, :kc].set(pc2)
            arr = arr.at[3, kc:].set(_SPAT_SENTINEL)
            return arr

        af0s = build_anchor_feat(af0)
        af1s = build_anchor_feat(af1)
        am0 = build_anchor_meta(ap1, af0)     # side 0: mask in cloud-1 space, a2 of f0
        am1 = build_anchor_meta(ap0, af1)     # side 1: mask in cloud-0 space, a2 of f1
        cf0t = build_cand_feat_t(cf0)
        cf1t = build_cand_feat_t(cf1)
        cp0t = build_cand_pt_t(cp0)
        cp1t = build_cand_pt_t(cp1)

        n_m = m_pad // tm
        n_k = k_pad // tk

        kernel = functools.partial(
            _hardest_contrastive_kernel,
            self.pos_margin, self.neg_margin, m, tm)

        anchor_feat_spec = pl.BlockSpec((tm, ca), lambda i, k: (i, 0))
        anchor_meta_spec = pl.BlockSpec((tm, 8), lambda i, k: (i, 0))
        cand_feat_spec = pl.BlockSpec((ca, tk), lambda i, k: (0, k))
        cand_pt_spec = pl.BlockSpec((8, tk), lambda i, k: (0, k))

        flops = 2 * (2 * m_pad * k_pad * (ca + 8))              # two sides, feat + spatial matmuls
        bytes_accessed = int(
            (af0s.size + af1s.size + am0.size + am1.size) * 4
            + n_m * ((cf0t.size + cf1t.size) * 2 + (cp0t.size + cp1t.size) * 4)
            + n_m * 3 * 128 * 4)

        # VMEM budget: (TM,TK) f32 intermediates dominate; keep headroom, cap for v7x.
        interm_bytes = 6 * tm * tk * 4
        inputs_db = 2 * (2 * (ca * tk * 2 + 8 * tk * 4) + 2 * (tm * ca * 4 + tm * 8 * 4))
        scratch_bytes = 2 * tm * 128 * 4
        vmem_limit = int(min(max(interm_bytes + inputs_db + scratch_bytes + (8 << 20),
                                 32 << 20), 48 << 20))

        out = pl.pallas_call(
            kernel,
            out_shape=jax.ShapeDtypeStruct((n_m, 3, 128), jnp.float32),
            grid_spec=pltpu.PrefetchScalarGridSpec(
                num_scalar_prefetch=0,
                grid=(n_m, n_k),
                in_specs=[anchor_feat_spec, anchor_meta_spec, cand_feat_spec, cand_pt_spec,
                          anchor_feat_spec, anchor_meta_spec, cand_feat_spec, cand_pt_spec],
                out_specs=pl.BlockSpec((1, 3, 128), lambda i, k: (i, 0, 0)),
                scratch_shapes=[pltpu.VMEM((tm, 128), jnp.float32),
                                pltpu.VMEM((tm, 128), jnp.float32)]),
            compiler_params=pltpu.CompilerParams(
                dimension_semantics=("parallel", "arbitrary"),
                vmem_limit_bytes=vmem_limit),
            cost_estimate=pl.CostEstimate(
                flops=flops, transcendentals=3 * m_pad,
                bytes_accessed=bytes_accessed),
        )(af0s, am0, cf1t, cp1t, af1s, am1, cf0t, cp0t)

        partial = out[:, :, 0]                                   # (n_m, 3)
        sums = jnp.sum(partial, axis=0)
        pos_loss = sums[0] / m
        neg_loss = 0.5 * (sums[1] + sums[2]) / m
        loss = pos_loss + neg_loss
        return loss, pos_loss, neg_loss


if __name__ == "__main__":
    key = jax.random.PRNGKey(0)
    k1, k2, k3, k4 = jax.random.split(key, 4)

    N0, N1, C = 600, 600, 32
    points0 = jax.random.uniform(k1, (N0, 3), minval=-3.0, maxval=3.0, dtype=jnp.float32)
    points1 = jax.random.uniform(k2, (N1, 3), minval=-3.0, maxval=3.0, dtype=jnp.float32)
    feats0 = jax.random.normal(k3, (N0, C), dtype=jnp.float32)
    feats1 = jax.random.normal(k4, (N1, C), dtype=jnp.float32)
    feats0 = feats0 / jnp.linalg.norm(feats0, axis=-1, keepdims=True)
    feats1 = feats1 / jnp.linalg.norm(feats1, axis=-1, keepdims=True)

    # deterministic correspondences: point i in cloud0 <-> point i in cloud1
    m_all = 200
    idx = jnp.arange(m_all, dtype=jnp.int32)
    correspondences = jnp.stack([idx, idx], axis=-1)

    module = HardestContrastiveLossGpu(
        pos_radius=0.1, neg_radius=1.4, pos_margin=0.1, neg_margin=1.4,
        max_correspondence=128, num_candidate=512)

    loss, pos_loss, neg_loss = module(points0, points1, feats0, feats1, correspondences)
    jax.block_until_ready((loss, pos_loss, neg_loss))
    assert jnp.isfinite(loss), "non-finite loss"
    print("KERNEL_OK")
</pallas_src>

<mosaic_0001>
module attributes {stable_mosaic.version = 11 : i64} {
  func.func @_hardest_contrastive_kernel(%arg0: i32, %arg1: i32, %arg2: memref<64x48xf32, #tpu.memory_space<vmem>>, %arg3: memref<64x8xf32, #tpu.memory_space<vmem>>, %arg4: memref<48x512xbf16, #tpu.memory_space<vmem>>, %arg5: memref<8x512xf32, #tpu.memory_space<vmem>>, %arg6: memref<64x48xf32, #tpu.memory_space<vmem>>, %arg7: memref<64x8xf32, #tpu.memory_space<vmem>>, %arg8: memref<48x512xbf16, #tpu.memory_space<vmem>>, %arg9: memref<8x512xf32, #tpu.memory_space<vmem>>, %arg10: memref<1x3x128xf32, #tpu.memory_space<vmem>>, %arg11: memref<64x128xf32, #tpu.memory_space<vmem>>, %arg12: memref<64x128xf32, #tpu.memory_space<vmem>>) attributes {dimension_semantics = [#tpu.dimension_semantics<parallel>, #tpu.dimension_semantics<arbitrary>], iteration_bounds = array<i64: 2, 1>, scalar_prefetch = 0 : i64, scratch_operands = 2 : i64, tpu.core_type = #tpu.core_type<tc>, window_params = [{transform_indices = @transform_0, window_bounds = array<i64: 64, 48>}, {transform_indices = @transform_1, window_bounds = array<i64: 64, 8>}, {transform_indices = @transform_2, window_bounds = array<i64: 48, 512>}, {transform_indices = @transform_3, window_bounds = array<i64: 8, 512>}, {transform_indices = @transform_4, window_bounds = array<i64: 64, 48>}, {transform_indices = @transform_5, window_bounds = array<i64: 64, 8>}, {transform_indices = @transform_6, window_bounds = array<i64: 48, 512>}, {transform_indices = @transform_7, window_bounds = array<i64: 8, 512>}, {transform_indices = @transform_8, window_bounds = array<i64: 1, 3, 128>}]} {
    %c0_i32 = arith.constant 0 : i32
    %0 = arith.cmpi eq, %arg1, %c0_i32 : i32
    %1 = arith.extui %0 : i1 to i32
    %c0_i32_0 = arith.constant 0 : i32
    %2 = arith.cmpi ne, %1, %c0_i32_0 : i32
    scf.if %2 {
      %cst_31 = arith.constant 1.000000e+10 : f32
      %50 = vector.broadcast %cst_31 : f32 to vector<64x128xf32>
      %c0_32 = arith.constant 0 : index
      %c0_33 = arith.constant 0 : index
      %51 = vector.load %arg11[%c0_32, %c0_33] : memref<64x128xf32, #tpu.memory_space<vmem>>, vector<64x128xf32>
      tpu.vector_store %arg11[%c0_32, %c0_33], %50 {strides = array<i32>} : memref<64x128xf32, #tpu.memory_space<vmem>>, vector<64x128xf32>,
      %cst_34 = arith.constant 1.000000e+10 : f32
      %52 = vector.broadcast %cst_34 : f32 to vector<64x128xf32>
      %c0_35 = arith.constant 0 : index
      %c0_36 = arith.constant 0 : index
      %53 = vector.load %arg12[%c0_35, %c0_36] : memref<64x128xf32, #tpu.memory_space<vmem>>, vector<64x128xf32>
      tpu.vector_store %arg12[%c0_35, %c0_36], %52 {strides = array<i32>} : memref<64x128xf32, #tpu.memory_space<vmem>>, vector<64x128xf32>,
    } else {
    }
    %c0 = arith.constant 0 : index
    %c0_1 = arith.constant 0 : index
    %3 = vector.load %arg2[%c0, %c0_1] : memref<64x48xf32, #tpu.memory_space<vmem>>, vector<64x48xf32>
    %4 = arith.truncf %3 : vector<64x48xf32> to vector<64x48xbf16>
    %c0_2 = arith.constant 0 : index
    %c0_3 = arith.constant 0 : index
    %5 = vector.load %arg4[%c0_2, %c0_3] : memref<48x512xbf16, #tpu.memory_space<vmem>>, vector<48x512xbf16>
    %cst = arith.constant dense<0.000000e+00> : vector<64x512xf32>
    %6 = tpu.matmul %4, %5, %cst {dimension_numbers = #tpu.dot_dimension_numbers<[1], [0], [0], [1], [0, 0, 1, 1], [], []>} : vector<64x48xbf16>, vector<48x512xbf16>, vector<64x512xf32> -> vector<64x512xf32>
    %c0_4 = arith.constant 0 : index
    %c0_5 = arith.constant 0 : index
    %7 = vector.load %arg3[%c0_4, %c0_5] : memref<64x8xf32, #tpu.memory_space<vmem>>, vector<64x8xf32>
    %c0_6 = arith.constant 0 : index
    %c0_7 = arith.constant 0 : index
    %8 = vector.load %arg5[%c0_6, %c0_7] : memref<8x512xf32, #tpu.memory_space<vmem>>, vector<8x512xf32>
    %cst_8 = arith.constant dense<0.000000e+00> : vector<64x512xf32>
    %9 = tpu.matmul %7, %8, %cst_8 {dimension_numbers = #tpu.dot_dimension_numbers<[1], [0], [0], [1], [0, 0, 1, 1], [], []>} : vector<64x8xf32>, vector<8x512xf32>, vector<64x512xf32> -> vector<64x512xf32>
    %10 = vector.extract_strided_slice %7 {offsets = [0, 4], sizes = [64, 1], strides = [1, 1]} : vector<64x8xf32> to vector<64x1xf32>
    %11 = vector.broadcast %10 : vector<64x1xf32> to vector<64x512xf32>
    %12 = arith.cmpf ogt, %9, %11 : vector<64x512xf32>
    %cst_9 = arith.constant 1.000000e+10 : f32
    %13 = vector.broadcast %cst_9 : f32 to vector<64x512xf32>
    %14 = arith.select %12, %6, %13 : vector<64x512xi1>, vector<64x512xf32>
    %15 = vector.extract_strided_slice %14 {offsets = [0, 0], sizes = [64, 128], strides = [1, 1]} : vector<64x512xf32> to vector<64x128xf32>
    %16 = vector.extract_strided_slice %14 {offsets = [0, 128], sizes = [64, 128], strides = [1, 1]} : vector<64x512xf32> to vector<64x128xf32>
    %17 = arith.minimumf %15, %16 : vector<64x128xf32>
    %18 = vector.extract_strided_slice %14 {offsets = [0, 256], sizes = [64, 128], strides = [1, 1]} : vector<64x512xf32> to vector<64x128xf32>
    %19 = arith.minimumf %17, %18 : vector<64x128xf32>
    %20 = vector.extract_strided_slice %14 {offsets = [0, 384], sizes = [64, 128], strides = [1, 1]} : vector<64x512xf32> to vector<64x128xf32>
    %21 = arith.minimumf %19, %20 : vector<64x128xf32>
    %c0_10 = arith.constant 0 : index
    %c0_11 = arith.constant 0 : index
    %22 = vector.load %arg11[%c0_10, %c0_11] : memref<64x128xf32, #tpu.memory_space<vmem>>, vector<64x128xf32>
    %23 = arith.minimumf %22, %21 : vector<64x128xf32>
    %c0_12 = arith.constant 0 : index
    %c0_13 = arith.constant 0 : index
    %24 = vector.load %arg11[%c0_12, %c0_13] : memref<64x128xf32, #tpu.memory_space<vmem>>, vector<64x128xf32>
    tpu.vector_store %arg11[%c0_12, %c0_13], %23 {strides = array<i32>} : memref<64x128xf32, #tpu.memory_space<vmem>>, vector<64x128xf32>,
    %c0_14 = arith.constant 0 : index
    %c0_15 = arith.constant 0 : index
    %25 = vector.load %arg6[%c0_14, %c0_15] : memref<64x48xf32, #tpu.memory_space<vmem>>, vector<64x48xf32>
    %26 = arith.truncf %25 : vector<64x48xf32> to vector<64x48xbf16>
    %c0_16 = arith.constant 0 : index
    %c0_17 = arith.constant 0 : index
    %27 = vector.load %arg8[%c0_16, %c0_17] : memref<48x512xbf16, #tpu.memory_space<vmem>>, vector<48x512xbf16>
    %cst_18 = arith.constant dense<0.000000e+00> : vector<64x512xf32>
    %28 = tpu.matmul %26, %27, %cst_18 {dimension_numbers = #tpu.dot_dimension_numbers<[1], [0], [0], [1], [0, 0, 1, 1], [], []>} : vector<64x48xbf16>, vector<48x512xbf16>, vector<64x512xf32> -> vector<64x512xf32>
    %c0_19 = arith.constant 0 : index
    %c0_20 = arith.constant 0 : index
    %29 = vector.load %arg7[%c0_19, %c0_20] : memref<64x8xf32, #tpu.memory_space<vmem>>, vector<64x8xf32>
    %c0_21 = arith.constant 0 : index
    %c0_22 = arith.constant 0 : index
    %30 = vector.load %arg9[%c0_21, %c0_22] : memref<8x512xf32, #tpu.memory_space<vmem>>, vector<8x512xf32>
    %cst_23 = arith.constant dense<0.000000e+00> : vector<64x512xf32>
    %31 = tpu.matmul %29, %30, %cst_23 {dimension_numbers = #tpu.dot_dimension_numbers<[1], [0], [0], [1], [0, 0, 1, 1], [], []>} : vector<64x8xf32>, vector<8x512xf32>, vector<64x512xf32> -> vector<64x512xf32>
    %32 = vector.extract_strided_slice %29 {offsets = [0, 4], sizes = [64, 1], strides = [1, 1]} : vector<64x8xf32> to vector<64x1xf32>
    %33 = vector.broadcast %32 : vector<64x1xf32> to vector<64x512xf32>
    %34 = arith.cmpf ogt, %31, %33 : vector<64x512xf32>
    %cst_24 = arith.constant 1.000000e+10 : f32
    %35 = vector.broadcast %cst_24 : f32 to vector<64x512xf32>
    %36 = arith.select %34, %28, %35 : vector<64x512xi1>, vector<64x512xf32>
    %37 = vector.extract_strided_slice %36 {offsets = [0, 0], sizes = [64, 128], strides = [1, 1]} : vector<64x512xf32> to vector<64x128xf32>
    %38 = vector.extract_strided_slice %36 {offsets = [0, 128], sizes = [64, 128], strides = [1, 1]} : vector<64x512xf32> to vector<64x128xf32>
    %39 = arith.minimumf %37, %38 : vector<64x128xf32>
    %40 = vector.extract_strided_slice %36 {offsets = [0, 256], sizes = [64, 128], strides = [1, 1]} : vector<64x512xf32> to vector<64x128xf32>
    %41 = arith.minimumf %39, %40 : vector<64x128xf32>
    %42 = vector.extract_strided_slice %36 {offsets = [0, 384], sizes = [64, 128], strides = [1, 1]} : vector<64x512xf32> to vector<64x128xf32>
    %43 = arith.minimumf %41, %42 : vector<64x128xf32>
    %c0_25 = arith.constant 0 : index
    %c0_26 = arith.constant 0 : index
    %44 = vector.load %arg12[%c0_25, %c0_26] : memref<64x128xf32, #tpu.memory_space<vmem>>, vector<64x128xf32>
    %45 = arith.minimumf %44, %43 : vector<64x128xf32>
    %c0_27 = arith.constant 0 : index
    %c0_28 = arith.constant 0 : index
    %46 = vector.load %arg12[%c0_27, %c0_28] : memref<64x128xf32, #tpu.memory_space<vmem>>, vector<64x128xf32>
    tpu.vector_store %arg12[%c0_27, %c0_28], %45 {strides = array<i32>} : memref<64x128xf32, #tpu.memory_space<vmem>>, vector<64x128xf32>,
    %c0_i32_29 = arith.constant 0 : i32
    %47 = arith.cmpi eq, %arg1, %c0_i32_29 : i32
    %48 = arith.extui %47 : i1 to i32
    %c0_i32_30 = arith.constant 0 : i32
    %49 = arith.cmpi ne, %48, %c0_i32_30 : i32
    scf.if %49 {
      %50 = tpu.iota {dimensions = array<i32: 0>} : vector<64x1xi32>
      %c64_i32 = arith.constant 64 : i32
      %51 = arith.muli %arg0, %c64_i32 : i32
      %52 = vector.broadcast %51 : i32 to vector<64x1xi32>
      %53 = arith.addi %50, %52 : vector<64x1xi32>
      %c128_i32 = arith.constant 128 : i32
      %54 = vector.broadcast %c128_i32 : i32 to vector<64x1xi32>
      %55 = arith.cmpi slt, %53, %54 : vector<64x1xi32>
      %c0_31 = arith.constant 0 : index
      %c0_32 = arith.constant 0 : index
      %56 = vector.load %arg2[%c0_31, %c0_32] : memref<64x48xf32, #tpu.memory_space<vmem>>, vector<64x48xf32>
      %c0_33 = arith.constant 0 : index
      %c0_34 = arith.constant 0 : index
      %57 = vector.load %arg6[%c0_33, %c0_34] : memref<64x48xf32, #tpu.memory_space<vmem>>, vector<64x48xf32>
      %58 = arith.subf %56, %57 : vector<64x48xf32>
      %59 = arith.mulf %58, %58 : vector<64x48xf32>
      %cst_35 = arith.constant dense<0.000000e+00> : vector<64xf32>
      %60 = vector.multi_reduction <add>, %59, %cst_35 [1] : vector<64x48xf32> to vector<64xf32>
      %61 = vector.shape_cast %60 : vector<64xf32> to vector<64x1xf32>
      %62 = math.sqrt %61 : vector<64x1xf32>
      %cst_36 = arith.constant 5.000000e-01 : f32
      %63 = vector.broadcast %cst_36 : f32 to vector<64x1xf32>
      %64 = arith.mulf %63, %62 : vector<64x1xf32>
      %cst_37 = arith.constant 1.000000e-01 : f32
      %65 = vector.broadcast %cst_37 : f32 to vector<64x1xf32>
      %66 = arith.subf %64, %65 : vector<64x1xf32>
      %cst_38 = arith.constant 0.000000e+00 : f32
      %67 = vector.broadcast %cst_38 : f32 to vector<64x1xf32>
      %68 = arith.maximumf %66, %67 : vector<64x1xf32>
      %69 = arith.mulf %68, %68 : vector<64x1xf32>
      %cst_39 = arith.constant 0.000000e+00 : f32
      %70 = vector.broadcast %cst_39 : f32 to vector<64x1xf32>
      %71 = arith.select %55, %69, %70 : vector<64x1xi1>, vector<64x1xf32>
      %cst_40 = arith.constant dense<0.000000e+00> : vector<1xf32>
      %72 = vector.multi_reduction <add>, %71, %cst_40 [0] : vector<64x1xf32> to vector<1xf32>
      %73 = vector.shape_cast %72 : vector<1xf32> to vector<1x1xf32>
      %c0_41 = arith.constant 0 : index
      %c0_42 = arith.constant 0 : index
      %74 = vector.load %arg3[%c0_41, %c0_42] : memref<64x8xf32, #tpu.memory_space<vmem>>, vector<64x8xf32>
      %75 = vector.extract_strided_slice %74 {offsets = [0, 5], sizes = [64, 1], strides = [1, 1]} : vector<64x8xf32> to vector<64x1xf32>
      %c0_43 = arith.constant 0 : index
      %c0_44 = arith.constant 0 : index
      %76 = vector.load %arg11[%c0_43, %c0_44] : memref<64x128xf32, #tpu.memory_space<vmem>>, vector<64x128xf32>
      %cst_45 = arith.constant dense<0x7F800000> : vector<64xf32>
      %77 = vector.multi_reduction <minimumf>, %76, %cst_45 [1] : vector<64x128xf32> to vector<64xf32>
      %78 = vector.shape_cast %77 : vector<64xf32> to vector<64x1xf32>
      %79 = arith.addf %78, %75 : vector<64x1xf32>
      %cst_46 = arith.constant 0.000000e+00 : f32
      %80 = vector.broadcast %cst_46 : f32 to vector<64x1xf32>
      %81 = arith.maximumf %79, %80 : vector<64x1xf32>
      %82 = math.sqrt %81 : vector<64x1xf32>
      %cst_47 = arith.constant 1.400000e+00 : f32
      %83 = vector.broadcast %cst_47 : f32 to vector<64x1xf32>
      %84 = arith.subf %83, %82 : vector<64x1xf32>
      %cst_48 = arith.constant 0.000000e+00 : f32
      %85 = vector.broadcast %cst_48 : f32 to vector<64x1xf32>
      %86 = arith.maximumf %84, %85 : vector<64x1xf32>
      %87 = arith.mulf %86, %86 : vector<64x1xf32>
      %cst_49 = arith.constant 0.000000e+00 : f32
      %88 = vector.broadcast %cst_49 : f32 to vector<64x1xf32>
      %89 = arith.select %55, %87, %88 : vector<64x1xi1>, vector<64x1xf32>
      %cst_50 = arith.constant dense<0.000000e+00> : vector<1xf32>
      %90 = vector.multi_reduction <add>, %89, %cst_50 [0] : vector<64x1xf32> to vector<1xf32>
      %91 = vector.shape_cast %90 : vector<1xf32> to vector<1x1xf32>
      %c0_51 = arith.constant 0 : index
      %c0_52 = arith.constant 0 : index
      %92 = vector.load %arg7[%c0_51, %c0_52] : memref<64x8xf32, #tpu.memory_space<vmem>>, vector<64x8xf32>
      %93 = vector.extract_strided_slice %92 {offsets = [0, 5], sizes = [64, 1], strides = [1, 1]} : vector<64x8xf32> to vector<64x1xf32>
      %c0_53 = arith.constant 0 : index
      %c0_54 = arith.constant 0 : index
      %94 = vector.load %arg12[%c0_53, %c0_54] : memref<64x128xf32, #tpu.memory_space<vmem>>, vector<64x128xf32>
      %cst_55 = arith.constant dense<0x7F800000> : vector<64xf32>
      %95 = vector.multi_reduction <minimumf>, %94, %cst_55 [1] : vector<64x128xf32> to vector<64xf32>
      %96 = vector.shape_cast %95 : vector<64xf32> to vector<64x1xf32>
      %97 = arith.addf %96, %93 : vector<64x1xf32>
      %cst_56 = arith.constant 0.000000e+00 : f32
      %98 = vector.broadcast %cst_56 : f32 to vector<64x1xf32>
      %99 = arith.maximumf %97, %98 : vector<64x1xf32>
      %100 = math.sqrt %99 : vector<64x1xf32>
      %cst_57 = arith.constant 1.400000e+00 : f32
      %101 = vector.broadcast %cst_57 : f32 to vector<64x1xf32>
      %102 = arith.subf %101, %100 : vector<64x1xf32>
      %cst_58 = arith.constant 0.000000e+00 : f32
      %103 = vector.broadcast %cst_58 : f32 to vector<64x1xf32>
      %104 = arith.maximumf %102, %103 : vector<64x1xf32>
      %105 = arith.mulf %104, %104 : vector<64x1xf32>
      %cst_59 = arith.constant 0.000000e+00 : f32
      %106 = vector.broadcast %cst_59 : f32 to vector<64x1xf32>
      %107 = arith.select %55, %105, %106 : vector<64x1xi1>, vector<64x1xf32>
      %cst_60 = arith.constant dense<0.000000e+00> : vector<1xf32>
      %108 = vector.multi_reduction <add>, %107, %cst_60 [0] : vector<64x1xf32> to vector<1xf32>
      %109 = vector.shape_cast %108 : vector<1xf32> to vector<1x1xf32>
      %110 = vector.shape_cast %73 : vector<1x1xf32> to vector<1x1xf32>
      %111 = vector.broadcast %110 : vector<1x1xf32> to vector<1x128xf32>
      %112 = vector.shape_cast %91 : vector<1x1xf32> to vector<1x1xf32>
      %113 = vector.broadcast %112 : vector<1x1xf32> to vector<1x128xf32>
      %114 = vector.shape_cast %109 : vector<1x1xf32> to vector<1x1xf32>
      %115 = vector.broadcast %114 : vector<1x1xf32> to vector<1x128xf32>
      %116 = tpu.concatenate %111, %113, %115 in 0 : vector<1x128xf32>, vector<1x128xf32>, vector<1x128xf32> -> vector<3x128xf32>
      %c0_61 = arith.constant 0 : index
      %c0_62 = arith.constant 0 : index
      %c0_63 = arith.constant 0 : index
      %117 = vector.load %arg10[%c0_61, %c0_62, %c0_63] : memref<1x3x128xf32, #tpu.memory_space<vmem>>, vector<1x3x128xf32>
      %118 = vector.shape_cast %117 : vector<1x3x128xf32> to vector<3x128xf32>
      %119 = vector.shape_cast %116 : vector<3x128xf32> to vector<1x3x128xf32>
      tpu.vector_store %arg10[%c0_61, %c0_62, %c0_63], %119 {strides = array<i32>} : memref<1x3x128xf32, #tpu.memory_space<vmem>>, vector<1x3x128xf32>,
    } else {
    }
    return
  }
  func.func @transform_0(%arg0: i32, %arg1: i32) -> (i32, i32) {
    %c0_i32 = arith.constant 0 : i32
    %c0_i32_0 = arith.constant 0 : i32
    return %arg0, %c0_i32 : i32, i32
  }
  func.func @transform_1(%arg0: i32, %arg1: i32) -> (i32, i32) {
    %c0_i32 = arith.constant 0 : i32
    %c0_i32_0 = arith.constant 0 : i32
    return %arg0, %c0_i32 : i32, i32
  }
  func.func @transform_2(%arg0: i32, %arg1: i32) -> (i32, i32) {
    %c0_i32 = arith.constant 0 : i32
    %c0_i32_0 = arith.constant 0 : i32
    return %c0_i32, %arg1 : i32, i32
  }
  func.func @transform_3(%arg0: i32, %arg1: i32) -> (i32, i32) {
    %c0_i32 = arith.constant 0 : i32
    %c0_i32_0 = arith.constant 0 : i32
    return %c0_i32, %arg1 : i32, i32
  }
  func.func @transform_4(%arg0: i32, %arg1: i32) -> (i32, i32) {
    %c0_i32 = arith.constant 0 : i32
    %c0_i32_0 = arith.constant 0 : i32
    return %arg0, %c0_i32 : i32, i32
  }
  func.func @transform_5(%arg0: i32, %arg1: i32) -> (i32, i32) {
    %c0_i32 = arith.constant 0 : i32
    %c0_i32_0 = arith.constant 0 : i32
    return %arg0, %c0_i32 : i32, i32
  }
  func.func @transform_6(%arg0: i32, %arg1: i32) -> (i32, i32) {
    %c0_i32 = arith.constant 0 : i32
    %c0_i32_0 = arith.constant 0 : i32
    return %c0_i32, %arg1 : i32, i32
  }
  func.func @transform_7(%arg0: i32, %arg1: i32) -> (i32, i32) {
    %c0_i32 = arith.constant 0 : i32
    %c0_i32_0 = arith.constant 0 : i32
    return %c0_i32, %arg1 : i32, i32
  }
  func.func @transform_8(%arg0: i32, %arg1: i32) -> (i32, i32, i32) {
    %c0_i32 = arith.constant 0 : i32
    %c0_i32_0 = arith.constant 0 : i32
    %c0_i32_1 = arith.constant 0 : i32
    return %arg0, %c0_i32, %c0_i32_0 : i32, i32, i32
  }
}

</mosaic_0001>

<bundles_post_ra>
// kernel: tpu_custom_call.1
= control target key start
LH: loop header
LB: loop body
LE: loop exit
PB: predicated region body
PF: predicated region fallthrough
CT: control target
= control target key end

     0   :  { %s2764_s27 = smov 0   ;;  %s2766_s28 = smov 0   ;;  %s3641_s0 = inlined_call_operand.vmem [shape: f32[128,48], index: 0, kind: input, shape index: {}]   ;;  %s3642_s1 = inlined_call_operand.vmem [shape: f32[128,8], index: 1, kind: input, shape index: {}]   ;;  %s3643_s2 = inlined_call_operand.vmem [shape: bf16[48,512], index: 2, kind: input, shape index: {}]   ;;  %s3644_s3 = inlined_call_operand.vmem [shape: f32[8,512], index: 3, kind: input, shape index: {}]   ;;  %s3645_s4 = inlined_call_operand.vmem [shape: f32[128,48], index: 4, kind: input, shape index: {}]   ;;  %s3646_s5 = inlined_call_operand.vmem [shape: f32[128,8], index: 5, kind: input, shape index: {}]   ;;  %s3647_s6 = inlined_call_operand.vmem [shape: bf16[48,512], index: 6, kind: input, shape index: {}]   ;;  %s3648_s7 = inlined_call_operand.vmem [shape: f32[8,512], index: 7, kind: input, shape index: {}]   ;;  %s3649_s8 = inlined_call_operand.vmem [shape: f32[2,3,128], index: 8, kind: output, shape index: {}]  }
   0x1   :  { %s2768_s29 = smov 0  }
   0x2 LB: > { %s30_s30 = sadd.s32 1, %s2709_s28  ;;  %p2482_p0 = scmp.ge.s32.totalorder %s2713_s29, 1  ;;  %s2713_s29 = sphi %s2768_s29, %s18_s29   ;;  %s2709_s28 = sphi %s2766_s28, %s3651_s28   ;;  %s2705_s27 = sphi %s2764_s27, %s3650_s27  }
   0x3   : > { %p32_p1 = scmp.ge.s32.totalorder %s30_s30, 2  ;;  %p352_p2 = scmp.lt.s32.totalorder %s2713_s29, 3 }
   0x5   : > { %s3653_s30 = smov (%p32_p1, %s30_s30), 0  ;;  %p353_p3 = pnand %p2482_p0, %p352_p2 }
   0x6   : > { %v2607_v0 = vld [vmem:[%s3643_s2 + $0x4] ss:$16 sps:$4 sm:$0xff] (!%p353_p3)   ;;  %s2483_s11 = sshll.u32 (!%p353_p3), %s2705_s27, 3  ;;  %v2609_v1 = vld [vmem:[%s3643_s2 + $0xc] ss:$16 sps:$4 sm:$0xff] (!%p353_p3)   ;;  %v2715_v2 = vmov (!%p353_p3), 0  }
   0x7   : > { %356 = sbr.rel (%p353_p3) target bundleno = 682 (0x2aa), region = 52  ;;  %622 = vmatprep.mubr.bf16.mxu0 (!%p353_p3), %v2715_v2  ;;  %695 = vmatprep.mubr.bf16.mxu1 (!%p353_p3), %v2715_v2  ;;  %p421_p4 = scmp.lt.s32.totalorder (!%p353_p3), %s2483_s11, 15  ;;  %v2611_v3 = vld [vmem:[%s3643_s2] ss:$16 sps:$4 sm:$0xff] (!%p353_p3)   ;;  %v2612_v4 = vld [vmem:[%s3643_s2 + $0x8] ss:$16 sps:$4 sm:$0xff] (!%p353_p3)  }
   0x8   : > { %590 = vmatprep.subr.bf16.mxu0 (!%p353_p3), %v2607_v0  ;;  %663 = vmatprep.subr.bf16.mxu1 (!%p353_p3), %v2609_v1  ;;  %v2613_v5 = vld [vmem:[%s3643_s2 + $0x24] ss:$16 sps:$4 sm:$0xff] (!%p353_p3)   ;;  %v2615_v6 = vld [vmem:[%s3643_s2 + $0x2c] ss:$16 sps:$4 sm:$0xff] (!%p353_p3)   ;;  %v2617_v7 = vld [vmem:[%s3643_s2 + $0x20] ss:$16 sps:$4 sm:$0xff] (!%p353_p3)  }
   0x9   : > { %591 = vmatpush1.bf16.msra.mxu0 (!%p353_p3), %v2611_v3  ;;  %664 = vmatpush1.bf16.msra.mxu1 (!%p353_p3), %v2612_v4  ;;  %v2618_v8 = vld [vmem:[%s3643_s2 + $0x28] ss:$16 sps:$4 sm:$0xff] (!%p353_p3)   ;;  %v2716_v9 = vmov (!%p353_p3), 4   ;;  %v2619_v10 = vld [vmem:[%s3643_s2 + $0x44] ss:$16 sps:$4 sm:$0xff] (!%p353_p3)   ;;  %vm577_vm0 = vcmask (!%p353_p3), 392192  }
   0xa   : > { %592 = vmatprep.subr.bf16.mxu0 (!%p353_p3), %v2613_v5  ;;  %2603 = vset.pattern.permute.xlu0 (!%p353_p3), %v2716_v9  ;;  %v2621_v11 = vld [vmem:[%s3643_s2 + $0x4c] ss:$16 sps:$4 sm:$0xff] (!%p353_p3)   ;;  %v2623_v12 = vld [vmem:[%s3643_s2 + $0x40] ss:$16 sps:$4 sm:$0xff] (!%p353_p3)   ;;  %v2624_v13 = vld [vmem:[%s3643_s2 + $0x48] ss:$16 sps:$4 sm:$0xff] (!%p353_p3)  }
   0xb   : > { %665 = vmatprep.subr.bf16.mxu1 (!%p353_p3), %v2615_v6  ;;  %2604 = vset.pattern.permute.xlu1 (!%p353_p3), %v2716_v9  ;;  %v745_v16 = vld [vmem:[%s3644_s3 + $0x8] sm:$0xff] (!%p353_p3)  ;;  %v747_v17 = vld [vmem:[%s3644_s3 + $0x18] sm:$0xff] (!%p353_p3)  ;;  %v744_v19 = vld [vmem:[%s3644_s3] sm:$0xff] (!%p353_p3)  ;;  %v2717_v41 = vmov (!%p353_p3), 0.0   ;;  %vm748_vm1 = vcmask (!%p353_p3), 64512   ;;  %p468_p5 = scmp.lt.s32.totalorder (!%p353_p3), %s2705_s27, 1 }
   0xc   : > { %v746_v20 = vld [vmem:[%s3644_s3 + $0x10] sm:$0xff] (!%p353_p3)  ;;  %v2630_v23 = vld [vmem:[%s3647_s6 + $0xc] ss:$16 sps:$4 sm:$0xff] (!%p353_p3)   ;;  %v2628_v47 = vld [vmem:[%s3647_s6 + $0x8] ss:$16 sps:$4 sm:$0xff] (!%p353_p3)  }
   0xd   : > { %593 = vmatpush1.bf16.msra.mxu0 (!%p353_p3), %v2617_v7  ;;  %666 = vmatpush1.bf16.msra.mxu1 (!%p353_p3), %v2618_v8  ;;  %v2627_v22 = vld [vmem:[%s3647_s6 + $0x4] ss:$16 sps:$4 sm:$0xff] (!%p353_p3)   ;;  %v2625_v44 = vld [vmem:[%s3647_s6] ss:$16 sps:$4 sm:$0xff] (!%p353_p3)   ;;  %v2636_v49 = vld [vmem:[%s3647_s6 + $0x2c] ss:$16 sps:$4 sm:$0xff] (!%p353_p3)  }
   0xe   : > { %s3655_s11 = smov (!%p421_p4, %s2483_s11), 15  ;;  %594 = vmatprep.subr.bf16.mxu0 %v2619_v10  ;;  %667 = vmatprep.subr.bf16.mxu1 %v2621_v11  ;;  %v2633_v48 = vld [vmem:[%s3647_s6 + $0x24] ss:$16 sps:$4 sm:$0xff]   ;;  %v2631_v50 = vld [vmem:[%s3647_s6 + $0x20] ss:$16 sps:$4 sm:$0xff]   ;;  %v1394_v56 = vld [vmem:[%s3648_s7 + $0x8] sm:$0xff] }
   0xf   : > { %s2811_s26 = sshll.u32 %s3655_s11, 3  ;;  %v2634_v51 = vld [vmem:[%s3647_s6 + $0x28] ss:$16 sps:$4 sm:$0xff]   ;;  %v2639_v52 = vld [vmem:[%s3647_s6 + $0x44] ss:$16 sps:$4 sm:$0xff]  }
  0x10   : > { %s2820_s14 = scalar_lea.vmem %s3641_s0, %s2811_s26  ;;  %s2843_s9 = scalar_lea.vmem %s3642_s1, %s2811_s26  ;;  %v2642_v53 = vld [vmem:[%s3647_s6 + $0x4c] ss:$16 sps:$4 sm:$0xff]   ;;  %v2637_v54 = vld [vmem:[%s3647_s6 + $0x40] ss:$16 sps:$4 sm:$0xff]   ;;  %v2640_v55 = vld [vmem:[%s3647_s6 + $0x48] ss:$16 sps:$4 sm:$0xff]  }
  0x11   : > { %v493_v14 = vld [vmem:[%s2820_s14] sm:$0xff]  ;;  %v494_v15 = vld [vmem:[%s2820_s14 + $0x8] sm:$0xff]  ;;  %595 = vmatpush1.bf16.msra.mxu0 %v2623_v12  ;;  %668 = vmatpush1.bf16.msra.mxu1 %v2624_v13  ;;  %v495_v24 = vld [vmem:[%s2820_s14 + $0x10] sm:$0xff]  ;;  %s2877_s21 = scalar_lea.vmem %s3646_s5, %s2811_s26  ;;  %s3024_s19 = scalar_lea.vmem %s3645_s4, %s2811_s26 }
  0x12   : > { %v501_v18 = vpack.c.bf16 %v494_v15, %v493_v14  ;;  %773 = vmatprep.subr.mxu0 %v745_v16  ;;  %886 = vmatprep.subr.mxu1 %v747_v17  ;;  %v2852_v21 = vld [vmem:[%s2843_s9] sm:$0xff]  ;;  %v496_v25 = vld [vmem:[%s2820_s14 + $0x18] sm:$0xff]  ;;  %v2868_v26 = vld [vmem:[%s2843_s9 + $0x8] sm:$0xff] }
  0x13   : > { %1000 = vperm.xlu0 %2603, %v2852_v21   ;;  %v502_v27 = vpack.c.bf16 %v496_v25, %v495_v24  ;;  %v497_v28 = vld [vmem:[%s2820_s14 + $0x20] sm:$0xff]  ;;  %v498_v29 = vld [vmem:[%s2820_s14 + $0x28] sm:$0xff]  ;;  %v2884_v30 = vld [vmem:[%s2843_s9 + $0x10] sm:$0xff] }
  0x14   : > { %2504 = vmatmul.mubr.msk.bf16.vlgmr.msra.gmra.mrb[0].mxu0 %vm577_vm0, %v501_v18  ;;  %2508 = vmatmul.mubr.msk.bf16.vlgmr.msra.gmra.mrb[0].mxu1 %vm577_vm0, %v501_v18  ;;  %v2888_v31 = vld [vmem:[%s2877_s21] sm:$0xff]  ;;  %v503_v32 = vpack.c.bf16 %v498_v29, %v497_v28  ;;  %v2892_v33 = vld [vmem:[%s2843_s9 + $0x18] sm:$0xff]  ;;  %v499_v34 = vld [vmem:[%s2820_s14 + $0x30] sm:$0xff] }
  0x15   : > { %774 = vmatpush1.msra.mxu0 %v744_v19  ;;  %887 = vmatpush1.msra.mxu1 %v746_v20  ;;  %v500_v35 = vld [vmem:[%s2820_s14 + $0x38] sm:$0xff]  ;;  %v2902_v36 = vld [vmem:[%s2843_s9 + $0x20] sm:$0xff]  ;;  %v2905_v37 = vld [vmem:[%s2877_s21 + $0x8] sm:$0xff] }
  0x16   : > { %632 = vmatprep.mubr.bf16.mxu0 %v2715_v2  ;;  %705 = vmatprep.mubr.bf16.mxu1 %v2715_v2  ;;  %v504_v38 = vpack.c.bf16 %v500_v35, %v499_v34  ;;  %v2910_v39 = vld [vmem:[%s2843_s9 + $0x28] sm:$0xff]  ;;  %v2913_v40 = vld [vmem:[%s2877_s21 + $0x10] sm:$0xff]  ;;  %v2925_v43 = vld [vmem:[%s2877_s21 + $0x18] sm:$0xff] }
  0x17   : > { %1239 = vmatprep.subr.bf16.mxu0 %v2627_v22  ;;  %1312 = vmatprep.subr.bf16.mxu1 %v2630_v23  ;;  %v2922_v42 = vld [vmem:[%s2843_s9 + $0x30] sm:$0xff]  ;;  %v2933_v45 = vld [vmem:[%s2843_s9 + $0x38] sm:$0xff]  ;;  %v2936_v46 = vld [vmem:[%s2877_s21 + $0x20] sm:$0xff] }
  0x18   : > { %1004 = vperm.xlu0 %2603, %v2868_v26   ;;  %1648 = vperm.xlu1 %2604, %v2888_v31   ;;  %v1396_v57 = vld [vmem:[%s3648_s7 + $0x18] sm:$0xff]  ;;  %v2998_v58 = vld [vmem:[%s2877_s21 + $0x28] sm:$0xff]  ;;  %v3008_v59 = vld [vmem:[%s2877_s21 + $0x30] sm:$0xff] }
  0x19   : > { %v3018_v60 = vld [vmem:[%s2877_s21 + $0x38] sm:$0xff]  ;;  %v3034_v61 = vld [vmem:[%s3024_s19] sm:$0xff]  ;;  %v3037_v62 = vld [vmem:[%s3024_s19 + $0x8] sm:$0xff] }
  0x1a   : > { %v1151_v63 = vpack.c.bf16 %v3037_v62, %v3034_v61  ;;  %v1393_v0 = vld [vmem:[%s3648_s7] sm:$0xff]  ;;  %v1395_v1 = vld [vmem:[%s3648_s7 + $0x10] sm:$0xff]  ;;  %v3059_v4 = vld [vmem:[%s3024_s19 + $0x18] sm:$0xff] }
  0x1b   : > { %v3056_v3 = vld [vmem:[%s3024_s19 + $0x10] sm:$0xff]  ;;  %v3070_v6 = vld [vmem:[%s3024_s19 + $0x20] sm:$0xff]  ;;  %v3073_v7 = vld [vmem:[%s3024_s19 + $0x28] sm:$0xff] }
  0x1c   : > { %2505 = vmatmul.mubr.msk.bf16.gmra.mrb[4].mxu0 %vm577_vm0, %v502_v27  ;;  %2509 = vmatmul.mubr.msk.bf16.gmra.mrb[4].mxu1 %vm577_vm0, %v502_v27  ;;  %v1152_v5 = vpack.c.bf16 %v3059_v4, %v3056_v3  ;;  %v1153_v8 = vpack.c.bf16 %v3073_v7, %v3070_v6  ;;  %v1149_v9 = vld [vmem:[%s3024_s19 + $0x30] sm:$0xff]  ;;  %v1150_v10 = vld [vmem:[%s3024_s19 + $0x38] sm:$0xff] }
  0x1d   : > { %642 = vmatprep.mubr.bf16.mxu0 %v2715_v2  ;;  %715 = vmatprep.mubr.bf16.mxu1 %v2715_v2  ;;  %v1154_v11 = vpack.c.bf16 %v1150_v10, %v1149_v9 }
  0x1e   : > { %1008 = vperm.xlu0 %2603, %v2884_v30   ;;  %1652 = vperm.xlu1 %2604, %v2905_v37  }
  0x22   : > { %1012 = vperm.xlu0 %2603, %v2892_v33   ;;  %1656 = vperm.xlu1 %2604, %v2913_v40  }
  0x24   : > { %2506 = vmatmul.mubr.msk.bf16.gmra.mrb[8].mxu0 %vm577_vm0, %v503_v32  ;;  %2510 = vmatmul.mubr.msk.bf16.gmra.mrb[8].mxu1 %vm577_vm0, %v503_v32 }
  0x25   : > { %652 = vmatprep.mubr.bf16.mxu0 %v2715_v2  ;;  %725 = vmatprep.mubr.bf16.mxu1 %v2715_v2 }
  0x26   : > { %1016 = vperm.xlu0 %2603, %v2902_v36   ;;  %1660 = vperm.xlu1 %2604, %v2925_v43  }
  0x2a   : > { %1020 = vperm.xlu0 %2603, %v2910_v39   ;;  %1664 = vperm.xlu1 %2604, %v2936_v46  }
  0x2c   : > { %2507 = vmatmul.mubr.msk.bf16.gmra.mrb[12].mxu0 %vm577_vm0, %v504_v38  ;;  %2511 = vmatmul.mubr.msk.bf16.gmra.mrb[12].mxu1 %vm577_vm0, %v504_v38 }
  0x2d   : > { %837 = vmatprep.mubr.f32.mxu0 %v2717_v41  ;;  %950 = vmatprep.mubr.f32.mxu1 %v2717_v41 }
  0x2e   : > { %1024 = vperm.xlu0 %2603, %v2922_v42   ;;  %1668 = vperm.xlu1 %2604, %v2998_v58  }
  0x32   : > { %1028 = vperm.xlu0 %2603, %v2933_v45   ;;  %1672 = vperm.xlu1 %2604, %v3008_v59  }
  0x34   : > { %2512 = vmatmul.mubr.msk.f32.vlgmr.msra.gmra.mrb[16].mxu0 %vm748_vm1, %v2852_v21  ;;  %2520 = vmatmul.mubr.msk.f32.vlgmr.msra.gmra.mrb[16].mxu1 %vm748_vm1, %v2852_v21 }
  0x35   : > { %1240 = vmatpush1.bf16.msra.mxu0 %v2625_v44  ;;  %843 = vmatprep.mubr.f32.mxu0 %v2717_v41 }
  0x36   : > { %956 = vmatprep.mubr.f32.mxu1 %v2717_v41  ;;  %1313 = vmatpush1.bf16.msra.mxu1 %v2628_v47 }
  0x37   : > { %1241 = vmatprep.subr.bf16.mxu0 %v2633_v48  ;;  %1314 = vmatprep.subr.bf16.mxu1 %v2636_v49 }
  0x38   : > { %2513 = vmatmul.mubr.msk.f32.gmra.mrb[18].mxu0 %vm748_vm1, %v2868_v26  ;;  %2521 = vmatmul.mubr.msk.f32.gmra.mrb[18].mxu1 %vm748_vm1, %v2868_v26 }
  0x39   : > { %849 = vmatprep.mubr.f32.mxu0 %v2717_v41  ;;  %962 = vmatprep.mubr.f32.mxu1 %v2717_v41 }
  0x3a   : > { %1242 = vmatpush1.bf16.msra.mxu0 %v2631_v50  ;;  %1315 = vmatpush1.bf16.msra.mxu1 %v2634_v51 }
  0x3b   : > { %1243 = vmatprep.subr.bf16.mxu0 %v2639_v52  ;;  %1316 = vmatprep.subr.bf16.mxu1 %v2642_v53 }
  0x3c   : > { %2514 = vmatmul.mubr.msk.f32.gmra.mrb[20].mxu0 %vm748_vm1, %v2884_v30  ;;  %2522 = vmatmul.mubr.msk.f32.gmra.mrb[20].mxu1 %vm748_vm1, %v2884_v30 }
  0x3d   : > { %855 = vmatprep.mubr.f32.mxu0 %v2717_v41  ;;  %968 = vmatprep.mubr.f32.mxu1 %v2717_v41 }
  0x3e   : > { %1244 = vmatpush1.bf16.msra.mxu0 %v2637_v54  ;;  %1317 = vmatpush1.bf16.msra.mxu1 %v2640_v55 }
  0x3f   : > { %1421 = vmatprep.subr.mxu0 %v1394_v56  ;;  %1534 = vmatprep.subr.mxu1 %v1396_v57 }
  0x40   : > { %2515 = vmatmul.mubr.msk.f32.gmra.mrb[22].mxu0 %vm748_vm1, %v2892_v33  ;;  %2523 = vmatmul.mubr.msk.f32.gmra.mrb[22].mxu1 %vm748_vm1, %v2892_v33 }
  0x41   : > { %861 = vmatprep.mubr.f32.mxu0 %v2717_v41  ;;  %974 = vmatprep.mubr.f32.mxu1 %v2717_v41 }
  0x42   : > { %1676 = vperm.xlu1 %2604, %v3018_v60  }
  0x44   : > { %2516 = vmatmul.mubr.msk.f32.gmra.mrb[24].mxu0 %vm748_vm1, %v2902_v36  ;;  %2524 = vmatmul.mubr.msk.f32.gmra.mrb[24].mxu1 %vm748_vm1, %v2902_v36 }
  0x45   : > { %867 = vmatprep.mubr.f32.mxu0 %v2717_v41  ;;  %980 = vmatprep.mubr.f32.mxu1 %v2717_v41 }
  0x48   : > { %2517 = vmatmul.mubr.msk.f32.gmra.mrb[26].mxu0 %vm748_vm1, %v2910_v39  ;;  %2525 = vmatmul.mubr.msk.f32.gmra.mrb[26].mxu1 %vm748_vm1, %v2910_v39 }
  0x49   : > { %873 = vmatprep.mubr.f32.mxu0 %v2717_v41  ;;  %986 = vmatprep.mubr.f32.mxu1 %v2717_v41 }
  0x4c   : > { %2518 = vmatmul.mubr.msk.f32.gmra.mrb[28].mxu0 %vm748_vm1, %v2922_v42  ;;  %2526 = vmatmul.mubr.msk.f32.gmra.mrb[28].mxu1 %vm748_vm1, %v2922_v42 }
  0x4d   : > { %879 = vmatprep.mubr.f32.mxu0 %v2717_v41  ;;  %992 = vmatprep.mubr.f32.mxu1 %v2717_v41 }
  0x50   : > { %2519 = vmatmul.mubr.msk.f32.gmra.mrb[30].mxu0 %vm748_vm1, %v2933_v45  ;;  %2527 = vmatmul.mubr.msk.f32.gmra.mrb[30].mxu1 %vm748_vm1, %v2933_v45 }
  0x51   : > { %1271 = vmatprep.mubr.bf16.mxu0 %v2715_v2  ;;  %1344 = vmatprep.mubr.bf16.mxu1 %v2715_v2 }
  0x54   : > { %2540 = vmatmul.mubr.msk.bf16.vlgmr.msra.gmra.mrb[32].mxu0 %vm577_vm0, %v1151_v63  ;;  %2544 = vmatmul.mubr.msk.bf16.vlgmr.msra.gmra.mrb[32].mxu1 %vm577_vm0, %v1151_v63 }
  0x55   : > { %1422 = vmatpush1.msra.mxu0 %v1393_v0  ;;  %1535 = vmatpush1.msra.mxu1 %v1395_v1 }
  0x56   : > { %1281 = vmatprep.mubr.bf16.mxu0 %v2715_v2  ;;  %1354 = vmatprep.mubr.bf16.mxu1 %v2715_v2 }
  0x5c   : > { %2541 = vmatmul.mubr.msk.bf16.gmra.mrb[36].mxu0 %vm577_vm0, %v1152_v5  ;;  %2545 = vmatmul.mubr.msk.bf16.gmra.mrb[36].mxu1 %vm577_vm0, %v1152_v5 }
  0x5d   : > { %1291 = vmatprep.mubr.bf16.mxu0 %v2715_v2  ;;  %1364 = vmatprep.mubr.bf16.mxu1 %v2715_v2 }
  0x64   : > { %2542 = vmatmul.mubr.msk.bf16.gmra.mrb[40].mxu0 %vm577_vm0, %v1153_v8  ;;  %2546 = vmatmul.mubr.msk.bf16.gmra.mrb[40].mxu1 %vm577_vm0, %v1153_v8 }
  0x65   : > { %1301 = vmatprep.mubr.bf16.mxu0 %v2715_v2  ;;  %1374 = vmatprep.mubr.bf16.mxu1 %v2715_v2 }
  0x6c   : > { %2543 = vmatmul.mubr.msk.bf16.gmra.mrb[44].mxu0 %vm577_vm0, %v1154_v11  ;;  %2547 = vmatmul.mubr.msk.bf16.gmra.mrb[44].mxu1 %vm577_vm0, %v1154_v11 }
  0x6d   : > { %1485 = vmatprep.mubr.f32.mxu0 %v2717_v41  ;;  %1598 = vmatprep.mubr.f32.mxu1 %v2717_v41 }
  0x74   : > { %2548 = vmatmul.mubr.msk.f32.vlgmr.msra.gmra.mrb[48].mxu0 %vm748_vm1, %v2888_v31  ;;  %2556 = vmatmul.mubr.msk.f32.vlgmr.msra.gmra.mrb[48].mxu1 %vm748_vm1, %v2888_v31 }
  0x75   : > { %1491 = vmatprep.mubr.f32.mxu0 %v2717_v41  ;;  %1604 = vmatprep.mubr.f32.mxu1 %v2717_v41 }
  0x78   : > { %2549 = vmatmul.mubr.msk.f32.gmra.mrb[50].mxu0 %vm748_vm1, %v2905_v37  ;;  %2557 = vmatmul.mubr.msk.f32.gmra.mrb[50].mxu1 %vm748_vm1, %v2905_v37 }
  0x79   : > { %1497 = vmatprep.mubr.f32.mxu0 %v2717_v41  ;;  %1610 = vmatprep.mubr.f32.mxu1 %v2717_v41 }
  0x7c   : > { %2550 = vmatmul.mubr.msk.f32.gmra.mrb[52].mxu0 %vm748_vm1, %v2913_v40  ;;  %2558 = vmatmul.mubr.msk.f32.gmra.mrb[52].mxu1 %vm748_vm1, %v2913_v40 }
  0x7d   : > { %1503 = vmatprep.mubr.f32.mxu0 %v2717_v41  ;;  %1616 = vmatprep.mubr.f32.mxu1 %v2717_v41 }
  0x80   : > { %2551 = vmatmul.mubr.msk.f32.gmra.mrb[54].mxu0 %vm748_vm1, %v2925_v43  ;;  %2559 = vmatmul.mubr.msk.f32.gmra.mrb[54].mxu1 %vm748_vm1, %v2925_v43 }
  0x81   : > { %1509 = vmatprep.mubr.f32.mxu0 %v2717_v41  ;;  %1622 = vmatprep.mubr.f32.mxu1 %v2717_v41 }
  0x84   : > { %2552 = vmatmul.mubr.msk.f32.gmra.mrb[56].mxu0 %vm748_vm1, %v2936_v46  ;;  %2560 = vmatmul.mubr.msk.f32.gmra.mrb[56].mxu1 %vm748_vm1, %v2936_v46 }
  0x85   : > { %1515 = vmatprep.mubr.f32.mxu0 %v2717_v41  ;;  %1628 = vmatprep.mubr.f32.mxu1 %v2717_v41 }
  0x88   : > { %2553 = vmatmul.mubr.msk.f32.gmra.mrb[58].mxu0 %vm748_vm1, %v2998_v58  ;;  %2561 = vmatmul.mubr.msk.f32.gmra.mrb[58].mxu1 %vm748_vm1, %v2998_v58 }
  0x89   : > { %1521 = vmatprep.mubr.f32.mxu0 %v2717_v41  ;;  %1634 = vmatprep.mubr.f32.mxu1 %v2717_v41 }
  0x8c   : > { %2554 = vmatmul.mubr.msk.f32.gmra.mrb[60].mxu0 %vm748_vm1, %v3008_v59  ;;  %2562 = vmatmul.mubr.msk.f32.gmra.mrb[60].mxu1 %vm748_vm1, %v3008_v59 }
  0x8d   : > { %1527 = vmatprep.mubr.f32.mxu0 %v2717_v41  ;;  %1640 = vmatprep.mubr.f32.mxu1 %v2717_v41 }
  0x90   : > { %2555 = vmatmul.mubr.msk.f32.gmra.mrb[62].mxu0 %vm748_vm1, %v3018_v60  ;;  %2563 = vmatmul.mubr.msk.f32.gmra.mrb[62].mxu1 %vm748_vm1, %v3018_v60 }
  0x92   : > { %v1001_v19 = vpop.permute.xlu0 %1000 }
  0x97   : > { %v1005_v28 = vpop.permute.xlu0 %1004 }
  0x9d   : > { %v1009_v37 = vpop.permute.xlu0 %1008 }
  0xa1   : > { %v1013_v46 = vpop.permute.xlu0 %1012 }
  0xa5   : > { %v3177_v55 = vpop.permute.xlu0 %1016 }
  0xe7   : > { %v624_v2 = vpop.f32.mrb[0].mxu0  ;;  %v697_v12 = vpop.f32.mrb[0].mxu1 }
  0xe8   : > { %v626_v13 = vpop.f32.mrb[1].mxu0  ;;  %v699_v14 = vpop.f32.mrb[1].mxu1 }
  0xe9   : > { %v628_v15 = vpop.f32.mrb[2].mxu0  ;;  %v701_v16 = vpop.f32.mrb[2].mxu1 }
  0xea   : > { %v630_v17 = vpop.f32.mrb[3].mxu0  ;;  %v703_v18 = vpop.f32.mrb[3].mxu1 }
  0xef   : > { %v634_v20 = vpop.f32.mrb[4].mxu0  ;;  %v707_v21 = vpop.f32.mrb[4].mxu1 }
  0xf0   : > { %v3133_v22 = vpop.f32.mrb[5].mxu0  ;;  %v3135_v23 = vpop.f32.mrb[5].mxu1 }
  0xf1   : > { %v3137_v24 = vpop.f32.mrb[6].mxu0  ;;  %v3139_v25 = vpop.f32.mrb[6].mxu1 }
  0xf2   : > { %v3141_v26 = vpop.f32.mrb[7].mxu0  ;;  %v3143_v27 = vpop.f32.mrb[7].mxu1 }
  0xf7   : > { %v3145_v29 = vpop.f32.mrb[8].mxu0  ;;  %v3147_v30 = vpop.f32.mrb[8].mxu1 }
  0xf8   : > { %v3149_v31 = vpop.f32.mrb[9].mxu0  ;;  %v3151_v32 = vpop.f32.mrb[9].mxu1 }
  0xf9   : > { %v3153_v33 = vpop.f32.mrb[10].mxu0  ;;  %v3155_v34 = vpop.f32.mrb[10].mxu1 }
  0xfa   : > { %v3157_v35 = vpop.f32.mrb[11].mxu0  ;;  %v3159_v36 = vpop.f32.mrb[11].mxu1 }
  0xff   : > { %v3161_v38 = vpop.f32.mrb[12].mxu0  ;;  %v3163_v39 = vpop.f32.mrb[12].mxu1 }
 0x100   : > { %v3165_v40 = vpop.f32.mrb[13].mxu0  ;;  %v3167_v41 = vpop.f32.mrb[13].mxu1 }
 0x101   : > { %v3169_v42 = vpop.f32.mrb[14].mxu0  ;;  %v3171_v43 = vpop.f32.mrb[14].mxu1 }
 0x102   : > { %v3173_v44 = vpop.f32.mrb[15].mxu0  ;;  %v3175_v45 = vpop.f32.mrb[15].mxu1 }
 0x107   : > { %v839_v47 = vpop.f32.mrb[16].mxu0  ;;  %v952_v48 = vpop.f32.mrb[16].mxu1 }
 0x108   : > { %vm1031_vm2 = vcmp.gt.f32.partialorder %v839_v47, %v1001_v19  ;;  %vm1033_vm3 = vcmp.gt.f32.partialorder %v952_v48, %v1001_v19  ;;  %v841_v49 = vpop.f32.mrb[17].mxu0  ;;  %v954_v50 = vpop.f32.mrb[17].mxu1 }
 0x109   : > { %v1063_v51 = vsel %vm1031_vm2, %v624_v2, 1e+10  ;;  %v1065_v52 = vsel %vm1033_vm3, %v697_v12, 1e+10  ;;  %vm1032_vm4 = vcmp.gt.f32.partialorder %v841_v49, %v1001_v19  ;;  %vm1034_vm5 = vcmp.gt.f32.partialorder %v954_v50, %v1001_v19 }
 0x10a   : > { %v1064_v53 = vsel %vm1032_vm4, %v626_v13, 1e+10  ;;  %v1066_v54 = vsel %vm1034_vm5, %v699_v14, 1e+10 }
 0x10b   : > { %v1095_v56 = vmin.f32 %v1063_v51, %v1064_v53  ;;  %v845_v57 = vpop.f32.mrb[18].mxu0  ;;  %v958_v58 = vpop.f32.mrb[18].mxu1 }
 0x10c   : > { %vm1035_vm6 = vcmp.gt.f32.partialorder %v845_v57, %v1005_v28  ;;  %vm1037_vm7 = vcmp.gt.f32.partialorder %v958_v58, %v1005_v28  ;;  %v847_v59 = vpop.f32.mrb[19].mxu0  ;;  %v960_v60 = vpop.f32.mrb[19].mxu1 }
 0x10d   : > { %v1067_v63 = vsel %vm1035_vm6, %v628_v15, 1e+10  ;;  %v1069_v0 = vsel %vm1037_vm7, %v701_v16, 1e+10  ;;  %vm1036_vm8 = vcmp.gt.f32.partialorder %v847_v59, %v1005_v28  ;;  %vm1038_vm9 = vcmp.gt.f32.partialorder %v960_v60, %v1005_v28 }
 0x10e   : > { %v1068_v1 = vsel %vm1036_vm8, %v630_v17, 1e+10  ;;  %v1070_v5 = vsel %vm1038_vm9, %v703_v18, 1e+10  ;;  %v1103_v8 = vmin.f32 %v1095_v56, %v1065_v52  ;;  %v1021_v18 = vpop.permute.xlu0 %1020 }
 0x10f   : > { %v1096_v9 = vmin.f32 %v1067_v63, %v1068_v1  ;;  %v851_v10 = vpop.f32.mrb[20].mxu0  ;;  %v964_v11 = vpop.f32.mrb[20].mxu1 }
 0x110   : > { %vm1039_vm10 = vcmp.gt.f32.partialorder %v851_v10, %v1009_v37  ;;  %vm1041_vm11 = vcmp.gt.f32.partialorder %v964_v11, %v1009_v37  ;;  %v853_v2 = vpop.f32.mrb[21].mxu0  ;;  %v966_v12 = vpop.f32.mrb[21].mxu1  ;;  %v1111_v13 = vmin.f32 %v1103_v8, %v1066_v54 }
 0x111   : > { %v1071_v14 = vsel %vm1039_vm10, %v634_v20, 1e+10  ;;  %v1073_v19 = vsel %vm1041_vm11, %v707_v21, 1e+10  ;;  %vm1040_vm12 = vcmp.gt.f32.partialorder %v853_v2, %v1009_v37  ;;  %vm1042_vm13 = vcmp.gt.f32.partialorder %v966_v12, %v1009_v37 }
 0x112   : > { %v1072_v15 = vsel %vm1040_vm12, %v3133_v22, 1e+10  ;;  %v1074_v16 = vsel %vm1042_vm13, %v3135_v23, 1e+10  ;;  %v1127_v28 = vmin.f32 %v1111_v13, 1e+10  ;;  %v1104_v17 = vmin.f32 %v1096_v9, %v1069_v0  ;;  %v1025_v63 = vpop.permute.xlu0 %1024 }
 0x113   : > { %v1097_v47 = vmin.f32 %v1071_v14, %v1072_v15  ;;  %v970_v48 = vpop.f32.mrb[22].mxu1  ;;  %v857_v49 = vpop.f32.mrb[22].mxu0 }
 0x114   : > { %vm1045_vm14 = vcmp.gt.f32.partialorder %v970_v48, %v1013_v46  ;;  %2002 = vmin.xlane.f32.xlu0 %v1127_v28  ;;  %vm1043_vm15 = vcmp.gt.f32.partialorder %v857_v49, %v1013_v46  ;;  %v859_v50 = vpop.f32.mrb[23].mxu0  ;;  %v972_v51 = vpop.f32.mrb[23].mxu1  ;;  %v1112_v52 = vmin.f32 %v1104_v17, %v1070_v5 }
 0x115   : > { %v1077_v20 = vsel %vm1045_vm14, %v3139_v25, 1e+10  ;;  %v1075_v21 = vsel %vm1043_vm15, %v3137_v24, 1e+10  ;;  %vm1044_vm1 = vcmp.gt.f32.partialorder %v859_v50, %v1013_v46  ;;  %vm1046_vm2 = vcmp.gt.f32.partialorder %v972_v51, %v1013_v46 }
 0x116   : > { %v1076_v22 = vsel %vm1044_vm1, %v3141_v26, 1e+10  ;;  %v1078_v23 = vsel %vm1046_vm2, %v3143_v27, 1e+10  ;;  %v1128_v37 = vmin.f32 %v1112_v52, 1e+10  ;;  %v1105_v53 = vmin.f32 %v1097_v47, %v1073_v19 }
 0x117   : > { %v1098_v54 = vmin.f32 %v1075_v21, %v1076_v22  ;;  %v976_v56 = vpop.f32.mrb[24].mxu1  ;;  %v863_v57 = vpop.f32.mrb[24].mxu0 }
 0x118   : > { %vm1049_vm3 = vcmp.gt.f32.partialorder %v976_v56, %v3177_v55  ;;  %2004 = vmin.xlane.f32.xlu1 %v1128_v37  ;;  %vm1047_vm4 = vcmp.gt.f32.partialorder %v863_v57, %v3177_v55  ;;  %v865_v58 = vpop.f32.mrb[25].mxu0  ;;  %v978_v25 = vpop.f32.mrb[25].mxu1  ;;  %v1113_v59 = vmin.f32 %v1105_v53, %v1074_v16 }
 0x119   : > { %v1081_v24 = vsel %vm1049_vm3, %v3147_v30, 1e+10  ;;  %v1079_v46 = vsel %vm1047_vm4, %v3145_v29, 1e+10  ;;  %vm1048_vm5 = vcmp.gt.f32.partialorder %v865_v58, %v3177_v55  ;;  %vm1050_vm6 = vcmp.gt.f32.partialorder %v978_v25, %v3177_v55 }
 0x11a   : > { %v1080_v26 = vsel %vm1048_vm5, %v3149_v31, 1e+10  ;;  %v1082_v27 = vsel %vm1050_vm6, %v3151_v32, 1e+10  ;;  %v1129_v60 = vmin.f32 %v1113_v59, 1e+10  ;;  %v1106_v0 = vmin.f32 %v1098_v54, %v1077_v20 }
 0x11b   : > { %v1099_v1 = vmin.f32 %v1079_v46, %v1080_v26  ;;  %v982_v5 = vpop.f32.mrb[26].mxu1  ;;  %v869_v8 = vpop.f32.mrb[26].mxu0 }
 0x11c   : > { %vm1053_vm7 = vcmp.gt.f32.partialorder %v982_v5, %v1021_v18  ;;  %2006 = vmin.xlane.f32.xlu1 %v1129_v60  ;;  %vm1051_vm8 = vcmp.gt.f32.partialorder %v869_v8, %v1021_v18  ;;  %v871_v30 = vpop.f32.mrb[27].mxu0  ;;  %v984_v9 = vpop.f32.mrb[27].mxu1  ;;  %v1114_v29 = vmin.f32 %v1106_v0, %v1078_v23  ;;  %v1825_v0 = vld [vmem:[%s2820_s14 + $0x20] sm:$0xff] }
 0x11d   : > { %v1085_v10 = vsel %vm1053_vm7, %v3155_v34, 1e+10  ;;  %v1083_v55 = vsel %vm1051_vm8, %v3153_v33, 1e+10  ;;  %vm1052_vm9 = vcmp.gt.f32.partialorder %v871_v30, %v1021_v18  ;;  %vm1054_vm10 = vcmp.gt.f32.partialorder %v984_v9, %v1021_v18 }
 0x11e   : > { %v1084_v31 = vsel %vm1052_vm9, %v3157_v35, 1e+10  ;;  %v1086_v32 = vsel %vm1054_vm10, %v3159_v36, 1e+10  ;;  %v1130_v11 = vmin.f32 %v1114_v29, 1e+10  ;;  %v1107_v2 = vmin.f32 %v1099_v1, %v1081_v24  ;;  %v1029_v35 = vpop.permute.xlu0 %1028 }
 0x11f   : > { %v1100_v12 = vmin.f32 %v1083_v55, %v1084_v31  ;;  %v988_v13 = vpop.f32.mrb[28].mxu1  ;;  %v875_v14 = vpop.f32.mrb[28].mxu0  ;;  %v1823_v24 = vld [vmem:[%s2820_s14 + $0x10] sm:$0xff] }
 0x120   : > { %vm1057_vm11 = vcmp.gt.f32.partialorder %v988_v13, %v1025_v63  ;;  %2008 = vmin.xlane.f32.xlu1 %v1130_v11  ;;  %vm1055_vm12 = vcmp.gt.f32.partialorder %v875_v14, %v1025_v63  ;;  %v877_v19 = vpop.f32.mrb[29].mxu0  ;;  %v990_v15 = vpop.f32.mrb[29].mxu1  ;;  %v1115_v16 = vmin.f32 %v1107_v2, %v1082_v27  ;;  %v1839_v60 = vsub.f32 %v1823_v24, %v3056_v3  ;;  %v1835_v11 = vld [vmem:[%s3024_s19 + $0x30] sm:$0xff] }
 0x121   : > { %v1089_v34 = vsel %vm1057_vm11, %v3163_v39, 1e+10  ;;  %v1087_v33 = vsel %vm1055_vm12, %v3161_v38, 1e+10  ;;  %vm1056_vm13 = vcmp.gt.f32.partialorder %v877_v19, %v1025_v63  ;;  %vm1058_vm14 = vcmp.gt.f32.partialorder %v990_v15, %v1025_v63  ;;  %v1649_v63 = vpop.permute.xlu1 %1648 }
 0x122   : > { %v1088_v36 = vsel %vm1056_vm13, %v3165_v40, 1e+10  ;;  %v1090_v28 = vsel %vm1058_vm14, %v3167_v41, 1e+10  ;;  %v1131_v17 = vmin.f32 %v1115_v16, 1e+10  ;;  %v1108_v18 = vmin.f32 %v1100_v12, %v1085_v10 }
 0x123   : > { %v1101_v47 = vmin.f32 %v1087_v33, %v1088_v36  ;;  %v994_v48 = vpop.f32.mrb[30].mxu1  ;;  %v881_v49 = vpop.f32.mrb[30].mxu0  ;;  %v1821_v40 = vld [vmem:[%s2820_s14] sm:$0xff]  ;;  %v1847_v10 = vmul.f32 %v1839_v60, %v1839_v60  ;;  %v1841_v3 = vsub.f32 %v1825_v0, %v3070_v6 }
 0x124   : > { %vm1061_vm15 = vcmp.gt.f32.partialorder %v994_v48, %v1029_v35  ;;  %2010 = vmin.xlane.f32.xlu1 %v1131_v17  ;;  %vm1059_vm1 = vcmp.gt.f32.partialorder %v881_v49, %v1029_v35  ;;  %v883_v50 = vpop.f32.mrb[31].mxu0  ;;  %v996_v39 = vpop.f32.mrb[31].mxu1  ;;  %v1116_v51 = vmin.f32 %v1108_v18, %v1086_v32  ;;  %v1837_v57 = vsub.f32 %v1821_v40, %v3034_v61  ;;  %v1827_v32 = vld [vmem:[%s2820_s14 + $0x30] sm:$0xff] }
 0x125   : > { %v1093_v38 = vsel %vm1061_vm15, %v3171_v43, 1e+10  ;;  %v1091_v52 = vsel %vm1059_vm1, %v3169_v42, 1e+10  ;;  %vm1060_vm2 = vcmp.gt.f32.partialorder %v883_v50, %v1029_v35  ;;  %vm1062_vm3 = vcmp.gt.f32.partialorder %v996_v39, %v1029_v35  ;;  %v1653_v14 = vpop.permute.xlu1 %1652 }
 0x126   : > { %v1092_v41 = vsel %vm1060_vm2, %v3173_v44, 1e+10  ;;  %v1094_v20 = vsel %vm1062_vm3, %v3175_v45, 1e+10  ;;  %v1132_v21 = vmin.f32 %v1116_v51, 1e+10  ;;  %v1109_v22 = vmin.f32 %v1101_v47, %v1089_v34 }
 0x127   : > { %v1102_v23 = vmin.f32 %v1091_v52, %v1092_v41  ;;  %v3206_v37 = vpop.f32.mrb[32].mxu0  ;;  %v3208_v53 = vpop.f32.mrb[32].mxu1  ;;  %v1845_v27 = vmul.f32 %v1837_v57, %v1837_v57  ;;  %v1859_v2 = vsel %vm577_vm0, %v1847_v10, 0.0  ;;  %v1849_v12 = vmul.f32 %v1841_v3, %v1841_v3 }
 0x128   : > { %2012 = vmin.xlane.f32.xlu1 %v1132_v21  ;;  %v3210_v54 = vpop.f32.mrb[33].mxu0  ;;  %v3212_v43 = vpop.f32.mrb[33].mxu1  ;;  %v1117_v42 = vmin.f32 %v1109_v22, %v1090_v28  ;;  %v1843_v13 = vsub.f32 %v1827_v32, %v1835_v11 }
 0x129   : > { %v3214_v56 = vpop.f32.mrb[34].mxu0  ;;  %v3216_v44 = vpop.f32.mrb[34].mxu1  ;;  %v1110_v45 = vmin.f32 %v1102_v23, %v1093_v38  ;;  %v1853_v29 = vsel %vm577_vm0, %v1845_v27, 0.0  ;;  %v1865_v35 = vsel %vm577_vm0, %v1849_v12, 0.0 }
 0x12a   : > { %v3219_v58 = vpop.f32.mrb[35].mxu0  ;;  %v3221_v25 = vpop.f32.mrb[35].mxu1  ;;  %v1133_v59 = vmin.f32 %v1117_v42, 1e+10  ;;  %v1851_v36 = vmul.f32 %v1843_v13, %v1843_v13 }
 0x12b   : > { %v1118_v46 = vmin.f32 %v1110_v45, %v1094_v20  ;;  %v1657_v47 = vpop.permute.xlu1 %1656 }
 0x12c   : > { %2014 = vmin.xlane.f32.xlu1 %v1133_v59  ;;  %v1871_v18 = vsel %vm577_vm0, %v1851_v36, 0.0 }
 0x12d   : > { %v1134_v26 = vmin.f32 %v1118_v46, 1e+10 }
 0x12f   : > { %v3226_v1 = vpop.f32.mrb[36].mxu0  ;;  %v3228_v5 = vpop.f32.mrb[36].mxu1 }
 0x130   : > { %2016 = vmin.xlane.f32.xlu1 %v1134_v26  ;;  %v3230_v61 = vpop.f32.mrb[37].mxu0  ;;  %v3232_v8 = vpop.f32.mrb[37].mxu1 }
 0x131   : > { %v3234_v30 = vpop.f32.mrb[38].mxu0  ;;  %v3236_v9 = vpop.f32.mrb[38].mxu1 }
 0x132   : > { %v3240_v55 = vpop.f32.mrb[39].mxu0  ;;  %v3242_v31 = vpop.f32.mrb[39].mxu1 }
 0x133   : > { %v1661_v41 = vpop.permute.xlu1 %1660 }
 0x134   : > { %1854 = vadd.xlane.f32.xlu1 %v1853_v29 }
 0x137   : > { %v3247_v19 = vpop.f32.mrb[40].mxu0  ;;  %v3249_v15 = vpop.f32.mrb[40].mxu1 }
 0x138   : > { %v3251_v16 = vpop.f32.mrb[41].mxu0  ;;  %v3253_v34 = vpop.f32.mrb[41].mxu1  ;;  %1860 = vadd.xlane.f32.xlu1 %v1859_v2 }
 0x139   : > { %v3255_v6 = vpop.f32.mrb[42].mxu0  ;;  %v3257_v33 = vpop.f32.mrb[42].mxu1 }
 0x13a   : > { %v3260_v28 = vpop.f32.mrb[43].mxu0  ;;  %v3262_v17 = vpop.f32.mrb[43].mxu1 }
 0x13b   : > { %v3283_v57 = vpop.permute.xlu1 %1664 }
 0x13c   : > { %1866 = vadd.xlane.f32.xlu1 %v1865_v35 }
 0x13f   : > { %v3265_v48 = vpop.f32.mrb[44].mxu0  ;;  %v3267_v49 = vpop.f32.mrb[44].mxu1 }
 0x140   : > { %v3269_v50 = vpop.f32.mrb[45].mxu0  ;;  %v3271_v39 = vpop.f32.mrb[45].mxu1  ;;  %1872 = vadd.xlane.f32.xlu1 %v1871_v18 }
 0x141   : > { %v3273_v51 = vpop.f32.mrb[46].mxu0  ;;  %v3275_v38 = vpop.f32.mrb[46].mxu1 }
 0x142   : > { %v3277_v52 = vpop.f32.mrb[47].mxu0  ;;  %v3279_v40 = vpop.f32.mrb[47].mxu1 }
 0x147   : > { %v1487_v20 = vpop.f32.mrb[48].mxu0  ;;  %v1600_v21 = vpop.f32.mrb[48].mxu1 }
 0x148   : > { %vm1679_vm4 = vcmp.gt.f32.partialorder %v1487_v20, %v1649_v63  ;;  %vm1681_vm5 = vcmp.gt.f32.partialorder %v1600_v21, %v1649_v63  ;;  %v1489_v22 = vpop.f32.mrb[49].mxu0  ;;  %v1602_v23 = vpop.f32.mrb[49].mxu1 }
 0x149   : > { %v1711_v42 = vsel %vm1679_vm4, %v3206_v37, 1e+10  ;;  %v1713_v45 = vsel %vm1681_vm5, %v3208_v53, 1e+10  ;;  %vm1680_vm6 = vcmp.gt.f32.partialorder %v1489_v22, %v1649_v63  ;;  %vm1682_vm7 = vcmp.gt.f32.partialorder %v1602_v23, %v1649_v63 }
 0x14a   : > { %v1712_v59 = vsel %vm1680_vm6, %v3210_v54, 1e+10  ;;  %v1714_v24 = vsel %vm1682_vm7, %v3212_v43, 1e+10 }
 0x14b   : > { %v1743_v46 = vmin.f32 %v1711_v42, %v1712_v59  ;;  %v1493_v26 = vpop.f32.mrb[50].mxu0  ;;  %v1606_v27 = vpop.f32.mrb[50].mxu1 }
 0x14c   : > { %vm1683_vm8 = vcmp.gt.f32.partialorder %v1493_v26, %v1653_v14  ;;  %vm1685_vm9 = vcmp.gt.f32.partialorder %v1606_v27, %v1653_v14  ;;  %v1495_v60 = vpop.f32.mrb[51].mxu0  ;;  %v1608_v0 = vpop.f32.mrb[51].mxu1 }
 0x14d   : > { %v1715_v29 = vsel %vm1683_vm8, %v3214_v56, 1e+10  ;;  %v1717_v37 = vsel %vm1685_vm9, %v3216_v44, 1e+10  ;;  %vm1684_vm10 = vcmp.gt.f32.partialorder %v1495_v60, %v1653_v14  ;;  %vm1686_vm11 = vcmp.gt.f32.partialorder %v1608_v0, %v1653_v14  ;;  %v1669_v44 = vpop.permute.xlu1 %1668 }
 0x14e   : > { %v1716_v53 = vsel %vm1684_vm10, %v3219_v58, 1e+10  ;;  %v1718_v63 = vsel %vm1686_vm11, %v3221_v25, 1e+10  ;;  %v1751_v54 = vmin.f32 %v1743_v46, %v1713_v45 }
 0x14f   : > { %v1744_v10 = vmin.f32 %v1715_v29, %v1716_v53  ;;  %v1499_v43 = vpop.f32.mrb[52].mxu0  ;;  %v1612_v3 = vpop.f32.mrb[52].mxu1 }
 0x150   : > { %vm1687_vm12 = vcmp.gt.f32.partialorder %v1499_v43, %v1657_v47  ;;  %vm1689_vm13 = vcmp.gt.f32.partialorder %v1612_v3, %v1657_v47  ;;  %v1501_v32 = vpop.f32.mrb[53].mxu0  ;;  %v1614_v11 = vpop.f32.mrb[53].mxu1  ;;  %v1759_v2 = vmin.f32 %v1751_v54, %v1714_v24 }
 0x151   : > { %v1719_v12 = vsel %vm1687_vm12, %v3226_v1, 1e+10  ;;  %v1721_v56 = vsel %vm1689_vm13, %v3228_v5, 1e+10  ;;  %vm1688_vm14 = vcmp.gt.f32.partialorder %v1501_v32, %v1657_v47  ;;  %vm1690_vm15 = vcmp.gt.f32.partialorder %v1614_v11, %v1657_v47 }
 0x152   : > { %v1720_v58 = vsel %vm1688_vm14, %v3230_v61, 1e+10  ;;  %v1722_v25 = vsel %vm1690_vm15, %v3232_v8, 1e+10  ;;  %v1775_v13 = vmin.f32 %v1759_v2, 1e+10  ;;  %v1752_v14 = vmin.f32 %v1744_v10, %v1717_v37 }
 0x153   : > { %v1745_v35 = vmin.f32 %v1719_v12, %v1720_v58  ;;  %v1618_v36 = vpop.f32.mrb[54].mxu1  ;;  %v1505_v18 = vpop.f32.mrb[54].mxu0 }
 0x154   : > { %vm1693_vm1 = vcmp.gt.f32.partialorder %v1618_v36, %v1661_v41  ;;  %2160 = vmin.xlane.f32.xlu0 %v1775_v13  ;;  %vm1691_vm2 = vcmp.gt.f32.partialorder %v1505_v18, %v1661_v41  ;;  %v1507_v20 = vpop.f32.mrb[55].mxu0  ;;  %v1620_v21 = vpop.f32.mrb[55].mxu1  ;;  %v1760_v1 = vmin.f32 %v1752_v14, %v1718_v63 }
 0x155   : > { %v1725_v5 = vsel %vm1693_vm1, %v3236_v9, 1e+10  ;;  %v1723_v47 = vsel %vm1691_vm2, %v3234_v30, 1e+10  ;;  %vm1692_vm3 = vcmp.gt.f32.partialorder %v1507_v20, %v1661_v41  ;;  %vm1694_vm4 = vcmp.gt.f32.partialorder %v1620_v21, %v1661_v41 }
 0x156   : > { %v1724_v61 = vsel %vm1692_vm3, %v3240_v55, 1e+10  ;;  %v1726_v8 = vsel %vm1694_vm4, %v3242_v31, 1e+10  ;;  %v1776_v22 = vmin.f32 %v1760_v1, 1e+10  ;;  %v1753_v23 = vmin.f32 %v1745_v35, %v1721_v56  ;;  %v1673_v55 = vpop.permute.xlu1 %1672 }
 0x157   : > { %v1746_v42 = vmin.f32 %v1723_v47, %v1724_v61  ;;  %v1624_v45 = vpop.f32.mrb[56].mxu1  ;;  %v1511_v59 = vpop.f32.mrb[56].mxu0  ;;  %v2718_v61 = vmov 5  }
 0x158   : > { %vm1697_vm5 = vcmp.gt.f32.partialorder %v1624_v45, %v3283_v57  ;;  %2162 = vmin.xlane.f32.xlu0 %v1776_v22  ;;  %vm1695_vm6 = vcmp.gt.f32.partialorder %v1511_v59, %v3283_v57  ;;  %v1513_v24 = vpop.f32.mrb[57].mxu0  ;;  %v1626_v9 = vpop.f32.mrb[57].mxu1  ;;  %v1761_v46 = vmin.f32 %v1753_v23, %v1722_v25  ;;  %2605 = vset.pattern.permute.xlu1 %v2718_v61  ;;  %v1824_v22 = vld [vmem:[%s2820_s14 + $0x18] sm:$0xff]  ;;  %v1826_v45 = vld [vmem:[%s2820_s14 + $0x28] sm:$0xff] }
 0x159   : > { %v1729_v30 = vsel %vm1697_vm5, %v3249_v15, 1e+10  ;;  %v1727_v41 = vsel %vm1695_vm6, %v3247_v19, 1e+10  ;;  %vm1696_vm7 = vcmp.gt.f32.partialorder %v1513_v24, %v3283_v57  ;;  %vm1698_vm8 = vcmp.gt.f32.partialorder %v1626_v9, %v3283_v57  ;;  %2606 = vset.pattern.permute.xlu0 %v2718_v61 }
 0x15a   : > { %v1728_v31 = vsel %vm1696_vm7, %v3251_v16, 1e+10  ;;  %v1730_v26 = vsel %vm1698_vm8, %v3253_v34, 1e+10  ;;  %v1777_v27 = vmin.f32 %v1761_v46, 1e+10  ;;  %v1754_v60 = vmin.f32 %v1746_v42, %v1725_v5 }
 0x15b   : > { %v1747_v0 = vmin.f32 %v1727_v41, %v1728_v31  ;;  %v1630_v29 = vpop.f32.mrb[58].mxu1  ;;  %v1517_v37 = vpop.f32.mrb[58].mxu0  ;;  %v1840_v42 = vsub.f32 %v1824_v22, %v3059_v4  ;;  %v1842_v9 = vsub.f32 %v1826_v45, %v3073_v7  ;;  %v1828_v46 = vld [vmem:[%s2820_s14 + $0x38] sm:$0xff] }
 0x15c   : > { %vm1701_vm9 = vcmp.gt.f32.partialorder %v1630_v29, %v1669_v44  ;;  %2164 = vmin.xlane.f32.xlu0 %v1777_v27  ;;  %vm1699_vm10 = vcmp.gt.f32.partialorder %v1517_v37, %v1669_v44  ;;  %v1519_v15 = vpop.f32.mrb[59].mxu0  ;;  %v1632_v53 = vpop.f32.mrb[59].mxu1  ;;  %v1762_v19 = vmin.f32 %v1754_v60, %v1726_v8  ;;  %v1986_v27 = vld [vmem:[%s2843_s9] sm:$0xff]  ;;  %v1987_v29 = vld [vmem:[%s2843_s9 + $0x8] sm:$0xff]  ;;  %v1993_v45 = vld [vmem:[%s2843_s9 + $0x38] sm:$0xff] }
 0x15d   : > { %v1733_v63 = vsel %vm1701_vm9, %v3257_v33, 1e+10  ;;  %v1731_v57 = vsel %vm1699_vm10, %v3255_v6, 1e+10  ;;  %vm1700_vm11 = vcmp.gt.f32.partialorder %v1519_v15, %v1669_v44  ;;  %vm1702_vm12 = vcmp.gt.f32.partialorder %v1632_v53, %v1669_v44  ;;  %v1988_v53 = vld [vmem:[%s2843_s9 + $0x10] sm:$0xff] }
 0x15e   : > { %v1732_v16 = vsel %vm1700_vm11, %v3260_v28, 1e+10  ;;  %v1734_v34 = vsel %vm1702_vm12, %v3262_v17, 1e+10  ;;  %v1778_v54 = vmin.f32 %v1762_v19, 1e+10  ;;  %v1755_v10 = vmin.f32 %v1747_v0, %v1729_v30  ;;  %v1677_v28 = vpop.permute.xlu1 %1676 }
 0x15f   : > { %v1748_v43 = vmin.f32 %v1731_v57, %v1732_v16  ;;  %v1636_v3 = vpop.f32.mrb[60].mxu1  ;;  %v1523_v32 = vpop.f32.mrb[60].mxu0  ;;  %v1848_v24 = vmul.f32 %v1840_v42, %v1840_v42  ;;  %v1850_v41 = vmul.f32 %v1842_v9, %v1842_v9 }
 0x160   : > { %vm1705_vm13 = vcmp.gt.f32.partialorder %v1636_v3, %v1673_v55  ;;  %2166 = vmin.xlane.f32.xlu0 %v1778_v54  ;;  %vm1703_vm14 = vcmp.gt.f32.partialorder %v1523_v32, %v1673_v55  ;;  %v1525_v11 = vpop.f32.mrb[61].mxu0  ;;  %v1638_v2 = vpop.f32.mrb[61].mxu1  ;;  %v1763_v12 = vmin.f32 %v1755_v10, %v1730_v26  ;;  %v1794_v10 = vlaneseq  ;;  %v1990_v3 = vld [vmem:[%s2843_s9 + $0x20] sm:$0xff] }
 0x161   : > { %v1737_v33 = vsel %vm1705_vm13, %v3267_v49, 1e+10  ;;  %v1735_v6 = vsel %vm1703_vm14, %v3265_v48, 1e+10  ;;  %vm1704_vm15 = vcmp.gt.f32.partialorder %v1525_v11, %v1673_v55  ;;  %vm1706_vm1 = vcmp.gt.f32.partialorder %v1638_v2, %v1673_v55 }
 0x162   : > { %v1736_v17 = vsel %vm1704_vm15, %v3269_v50, 1e+10  ;;  %v1738_v56 = vsel %vm1706_vm1, %v3271_v39, 1e+10  ;;  %v1779_v44 = vmin.f32 %v1763_v12, 1e+10  ;;  %v1756_v58 = vmin.f32 %v1748_v43, %v1733_v63 }
 0x163   : > { %v1749_v25 = vmin.f32 %v1735_v6, %v1736_v17  ;;  %v1642_v13 = vpop.f32.mrb[62].mxu1  ;;  %v1529_v14 = vpop.f32.mrb[62].mxu0  ;;  %v1822_v50 = vld [vmem:[%s2820_s14 + $0x8] sm:$0xff]  ;;  %v1862_v30 = vsel %vm577_vm0, %v1848_v24, 0.0  ;;  %v1868_v4 = vsel %vm577_vm0, %v1850_v41, 0.0  ;;  %s2564_s14 = sshll.u32 %s2705_s27, 6 }
 0x164   : > { %vm1709_vm2 = vcmp.gt.f32.partialorder %v1642_v13, %v1677_v28  ;;  %2168 = vmin.xlane.f32.xlu0 %v1779_v44  ;;  %vm1707_vm3 = vcmp.gt.f32.partialorder %v1529_v14, %v1677_v28  ;;  %v1531_v35 = vpop.f32.mrb[63].mxu0  ;;  %v1644_v49 = vpop.f32.mrb[63].mxu1  ;;  %v1764_v36 = vmin.f32 %v1756_v58, %v1734_v34  ;;  %v1989_v34 = vld [vmem:[%s2843_s9 + $0x18] sm:$0xff]  ;;  %v3339_v12 = vshrl.u32 %v1794_v10, 7  ;;  %s3657_s27 = smov (!%p468_p5, %s2705_s27), 1 }
 0x165   : > { %v1741_v48 = vsel %vm1709_vm2, %v3275_v38, 1e+10  ;;  %v1739_v18 = vsel %vm1707_vm3, %v3273_v51, 1e+10  ;;  %vm1708_vm4 = vcmp.gt.f32.partialorder %v1531_v35, %v1677_v28  ;;  %vm1710_vm5 = vcmp.gt.f32.partialorder %v1644_v49, %v1677_v28 }
 0x166   : > { %v1740_v39 = vsel %vm1708_vm4, %v3277_v52, 1e+10  ;;  %v1742_v20 = vsel %vm1710_vm5, %v3279_v40, 1e+10  ;;  %v1780_v21 = vmin.f32 %v1764_v36, 1e+10  ;;  %v1757_v1 = vmin.f32 %v1749_v25, %v1737_v33 }
 0x167   : > { %v1750_v5 = vmin.f32 %v1739_v18, %v1740_v39  ;;  %v1838_v51 = vsub.f32 %v1822_v50, %v3037_v62  ;;  %v1836_v62 = vld [vmem:[%s3024_s19 + $0x38] sm:$0xff]  ;;  %v3341_v6 = vstv %s2564_s14  ;;  %v1796_v25 = vadd.s32 8, %v3339_v12  ;;  %v1992_v18 = vld [vmem:[%s2843_s9 + $0x30] sm:$0xff] }
 0x168   : > { %2170 = vmin.xlane.f32.xlu0 %v1780_v21  ;;  %v1765_v47 = vmin.f32 %v1757_v1, %v1738_v56  ;;  %v1844_v55 = vsub.f32 %v1828_v46, %v1836_v62  ;;  %v1991_v56 = vld [vmem:[%s2843_s9 + $0x28] sm:$0xff]  ;;  %v3350_v13 = vadd.s32 %v3341_v6, %v3339_v12  ;;  %v1797_v35 = vadd.s32 16, %v3339_v12  ;;  %s2491_s9 = sshll.u32 %s3657_s27, 2 }
 0x169   : > { %v1758_v38 = vmin.f32 %v1750_v5, %v1741_v48  ;;  %v1846_v40 = vmul.f32 %v1838_v51, %v1838_v51  ;;  %v1798_v21 = vadd.s32 24, %v3339_v12  ;;  %v3364_v46 = vadd.s32 %v3341_v6, %v1796_v25  ;;  %s471_s25 = scalar_lea.vmem %s3649_s8, %s2491_s9 }
 0x16a   : > { %v1781_v8 = vmin.f32 %v1765_v47, 1e+10  ;;  %v1852_v31 = vmul.f32 %v1844_v55, %v1844_v55  ;;  %v3367_v62 = vadd.s32 %v3341_v6, %v1797_v35  ;;  %vm1813_vm11 = vcmp.lt.s32.totalorder %v3350_v13, 128 }
 0x16b   : > { %v1766_v23 = vmin.f32 %v1758_v38, %v1742_v20  ;;  %v1856_v59 = vsel %vm577_vm0, %v1846_v40, 0.0  ;;  %v3372_v55 = vadd.s32 %v3341_v6, %v1798_v21  ;;  %vm2122_vm15 = vcmask 48168  }
 0x16c   : > { %2172 = vmin.xlane.f32.xlu0 %v1781_v8  ;;  %v1874_v26 = vsel %vm577_vm0, %v1852_v31, 0.0  ;;  %vm1814_vm2 = vcmp.lt.s32.totalorder %v3364_v46, 128  ;;  %vm1815_vm3 = vcmp.lt.s32.totalorder %v3367_v62, 128 }
 0x16d   : > { %v1782_v52 = vmin.f32 %v1766_v23, 1e+10  ;;  %v1799_v23 = vadd.s32 32, %v3339_v12  ;;  %vm1816_vm4 = vcmp.lt.s32.totalorder %v3372_v55, 128 }
 0x170   : > { %2174 = vmin.xlane.f32.xlu0 %v1782_v52 }
 0x174   : > { %1857 = vadd.xlane.f32.xlu0 %v1856_v59 }
 0x178   : > { %1863 = vadd.xlane.f32.xlu0 %v1862_v30 }
 0x17c   : > { %1869 = vadd.xlane.f32.xlu0 %v1868_v4 }
 0x180   : > { %1875 = vadd.xlane.f32.xlu0 %v1874_v26  ;;  %v3378_v26 = vadd.s32 %v3341_v6, %v1799_v23 }
 0x182   : > { %vm1817_vm5 = vcmp.lt.s32.totalorder %v3378_v26, 128 }
 0x1a1   : > { %v2003_v7 = vpop.xlane.xlu0 %2002 }
 0x1a2   : > { %v2018_v60 = vadd.f32 %v2003_v7, %v1986_v27 }
 0x1a4   : > { %v2026_v0 = vmax.f32 %v2018_v60, 0.0 }
 0x1a5   : > { %v2005_v37 = vpop.xlane.xlu1 %2004 }
 0x1a6   : > { %2643 = vrsqrt.f32 %v2026_v0  ;;  %v2019_v15 = vadd.f32 %v2005_v37, %v1987_v29  ;;  %vm2036_vm0 = vcmp.eq.f32.partialorder %v2026_v0, inf  ;;  %v2039_v39 = vand.u32 2147483648, %v2026_v0 }
 0x1a7   : > { %vm2038_vm8 = vcmp.eq.f32.partialorder %v2026_v0, 0.0 }
 0x1a8   : > { %v2027_v19 = vmax.f32 %v2019_v15, 0.0 }
 0x1a9   : > { %v2007_v63 = vpop.xlane.xlu1 %2006 }
 0x1aa   : > { %v2020_v57 = vadd.f32 %v2007_v63, %v1988_v53  ;;  %2645 = vrsqrt.f32 %v2027_v19  ;;  %vm2043_vm6 = vcmp.eq.f32.partialorder %v2027_v19, inf  ;;  %v2046_v36 = vand.u32 2147483648, %v2027_v19 }
 0x1ab   : > { %vm2045_vm7 = vcmp.eq.f32.partialorder %v2027_v19, 0.0 }
 0x1ac   : > { %v2028_v16 = vmax.f32 %v2020_v57, 0.0 }
 0x1ad   : > { %v2009_v54 = vpop.xlane.xlu1 %2008 }
 0x1ae   : > { %2647 = vrsqrt.f32 %v2028_v16  ;;  %v2021_v43 = vadd.f32 %v2009_v54, %v1989_v34  ;;  %vm2050_vm9 = vcmp.eq.f32.partialorder %v2028_v16, inf  ;;  %v2053_v51 = vand.u32 2147483648, %v2028_v16 }
 0x1af   : > { %vm2052_vm10 = vcmp.eq.f32.partialorder %v2028_v16, 0.0  ;;  %v1801_v34 = vadd.s32 48, %v3339_v12 }
 0x1b0   : > { %v2644_v32 = vpop.eup %2643  ;;  %v3337_v11 = vmax.f32 %v2021_v43, 0.0 }
 0x1b1   : > { %v2011_v2 = vpop.xlane.xlu1 %2010  ;;  %v2035_v28 = vmul.f32 %v2644_v32, %v2026_v0 }
 0x1b2   : > { %v2022_v33 = vadd.f32 %v2011_v2, %v1990_v3  ;;  %2649 = vrsqrt.f32 %v3337_v11  ;;  %vm2057_vm12 = vcmp.eq.f32.partialorder %v3337_v11, inf  ;;  %v2060_v4 = vand.u32 2147483648, %v3337_v11 }
 0x1b3   : > { %v2037_v49 = vsel %vm2036_vm0, %v2026_v0, %v2035_v28  ;;  %vm2059_vm13 = vcmp.eq.f32.partialorder %v3337_v11, 0.0  ;;  %v1800_v0 = vadd.s32 40, %v3339_v12 }
 0x1b4   : > { %v3344_v17 = vmax.f32 %v2022_v33, 0.0  ;;  %v2646_v44 = vpop.eup %2645  ;;  %v2040_v38 = vsel %vm2038_vm8, %v2039_v39, %v2037_v49 }
 0x1b5   : > { %v2013_v58 = vpop.xlane.xlu1 %2012  ;;  %v2042_v14 = vmul.f32 %v2646_v44, %v2027_v19  ;;  %v2090_v24 = vsub.f32 1.4, %v2040_v38  ;;  %v3397_v28 = vadd.s32 %v3341_v6, %v1800_v0 }
 0x1b6   : > { %2651 = vrsqrt.f32 %v3344_v17  ;;  %v2023_v48 = vadd.f32 %v2013_v58, %v1991_v56  ;;  %vm2064_vm14 = vcmp.eq.f32.partialorder %v3344_v17, inf  ;;  %v2067_v57 = vand.u32 2147483648, %v3344_v17 }
 0x1b7   : > { %v2044_v20 = vsel %vm2043_vm6, %v2027_v19, %v2042_v14  ;;  %v2098_v29 = vmax.f32 %v2090_v24, 0.0  ;;  %vm2066_vm1 = vcmp.eq.f32.partialorder %v3344_v17, 0.0  ;;  %v3403_v56 = vadd.s32 %v3341_v6, %v1801_v34 }
 0x1b8   : > { %v2648_v50 = vpop.eup %2647  ;;  %v2047_v1 = vsel %vm2045_vm7, %v2046_v36, %v2044_v20  ;;  %v3356_v47 = vmax.f32 %v2023_v48, 0.0 }
 0x1b9   : > { %v2049_v5 = vmul.f32 %v2648_v50, %v2028_v16  ;;  %v2015_v61 = vpop.xlane.xlu1 %2014  ;;  %v2091_v52 = vsub.f32 1.4, %v2047_v1  ;;  %v2106_v32 = vmul.f32 %v2098_v29, %v2098_v29 }
 0x1ba   : > { %v2024_v8 = vadd.f32 %v2015_v61, %v1992_v18  ;;  %2653 = vrsqrt.f32 %v3356_v47  ;;  %vm2071_vm0 = vcmp.eq.f32.partialorder %v3356_v47, inf  ;;  %vm2073_vm6 = vcmp.eq.f32.partialorder %v3356_v47, 0.0 }
 0x1bb   : > { %v2051_v22 = vsel %vm2050_vm9, %v2028_v16, %v2049_v5  ;;  %v2099_v7 = vmax.f32 %v2091_v52, 0.0  ;;  %v2114_v48 = vsel %vm1813_vm11, %v2106_v32, 0.0  ;;  %vm1818_vm9 = vcmp.lt.s32.totalorder %v3397_v28, 128 }
 0x1bc   : > { %v2054_v40 = vsel %vm2052_vm10, %v2053_v51, %v2051_v22  ;;  %v3360_v42 = vmax.f32 %v2024_v8, 0.0  ;;  %v2650_v59 = vpop.eup %2649  ;;  %v1802_v5 = vadd.s32 56, %v3339_v12  ;;  %vm1819_vm10 = vcmp.lt.s32.totalorder %v3403_v56, 128 }
 0x1bd   : > { %v2017_v9 = vpop.xlane.xlu1 %2016  ;;  %v2092_v30 = vsub.f32 1.4, %v2054_v40  ;;  %v2056_v41 = vmul.f32 %v2650_v59, %v3337_v11  ;;  %v2107_v54 = vmul.f32 %v2099_v7, %v2099_v7  ;;  %v2123_v22 = vsel %vm2122_vm15, %v2114_v48, 0.0 }
 0x1be   : > { %2655 = vrsqrt.f32 %v3360_v42  ;;  %v2025_v31 = vadd.f32 %v2017_v9, %v1993_v45  ;;  %vm2078_vm7 = vcmp.eq.f32.partialorder %v3360_v42, inf  ;;  %v2081_v18 = vand.u32 2147483648, %v3360_v42 }
 0x1bf   : > { %v2058_v60 = vsel %vm2057_vm12, %v3337_v11, %v2056_v41  ;;  %v2100_v19 = vmax.f32 %v2092_v30, 0.0  ;;  %v2115_v35 = vsel %vm1814_vm2, %v2107_v54, 0.0  ;;  %vm2080_vm8 = vcmp.eq.f32.partialorder %v3360_v42, 0.0 }
 0x1c0   : > { %v2652_v27 = vpop.eup %2651  ;;  %v2061_v37 = vsel %vm2059_vm13, %v2060_v4, %v2058_v60  ;;  %v3384_v53 = vmax.f32 %v2025_v31, 0.0  ;;  %v2124_v1 = vsel %vm2122_vm15, %v2115_v35, 0.0  ;;  %v3437_v4 = vadd.s32 %v3341_v6, %v1802_v5 }
 0x1c1   : > { %v2063_v15 = vmul.f32 %v2652_v27, %v3344_v17  ;;  %v2093_v63 = vsub.f32 1.4, %v2061_v37  ;;  %v2108_v2 = vmul.f32 %v2100_v19, %v2100_v19  ;;  %v2125_v12 = vadd.f32 %v2124_v1, %v2123_v22  ;;  %v1855_v60 = vpop.xlane.xlu1 %1854 }
 0x1c2   : > { %2657 = vrsqrt.f32 %v3384_v53  ;;  %vm2085_vm12 = vcmp.eq.f32.partialorder %v3384_v53, inf  ;;  %v2088_v45 = vand.u32 2147483648, %v3384_v53  ;;  %vm2087_vm13 = vcmp.eq.f32.partialorder %v3384_v53, 0.0 }
 0x1c3   : > { %v2065_v16 = vsel %vm2064_vm14, %v3344_v17, %v2063_v15  ;;  %v2101_v10 = vmax.f32 %v2093_v63, 0.0  ;;  %v2074_v17 = vand.u32 2147483648, %v3356_v47  ;;  %v2116_v20 = vsel %vm1815_vm3, %v2108_v2, 0.0  ;;  %v2144_v2 = vld [vmem:[%s2877_s21] sm:$0xff] }
 0x1c4   : > { %v2068_v43 = vsel %vm2066_vm1, %v2067_v57, %v2065_v16  ;;  %v2654_v3 = vpop.eup %2653  ;;  %v2126_v23 = vsel %vm2122_vm15, %v2116_v20, 0.0  ;;  %vm1820_vm14 = vcmp.lt.s32.totalorder %v3437_v4, 128  ;;  %2659 = vrsqrt.f32 %v1855_v60  ;;  %v2146_v20 = vld [vmem:[%s2877_s21 + $0x10] sm:$0xff] }
 0x1c5   : > { %v2094_v11 = vsub.f32 1.4, %v2068_v43  ;;  %v2070_v33 = vmul.f32 %v2654_v3, %v3356_v47  ;;  %v2109_v14 = vmul.f32 %v2101_v10, %v2101_v10  ;;  %v2127_v41 = vadd.f32 %v2126_v23, %v2125_v12  ;;  %v1861_v16 = vpop.xlane.xlu1 %1860 }
 0x1c6   : > { %2661 = vrsqrt.f32 %v1861_v16  ;;  %vm1879_vm1 = vcmp.eq.f32.partialorder %v1855_v60, inf }
 0x1c7   : > { %v2102_v44 = vmax.f32 %v2094_v11, 0.0  ;;  %v2072_v25 = vsel %vm2071_vm0, %v3356_v47, %v2070_v33  ;;  %v2117_v38 = vsel %vm1816_vm4, %v2109_v14, 0.0  ;;  %vm1881_vm0 = vcmp.eq.f32.partialorder %v1855_v60, 0.0 }
 0x1c8   : > { %v2656_v58 = vpop.eup %2655  ;;  %v2075_v36 = vsel %vm2073_vm6, %v2074_v17, %v2072_v25  ;;  %v2128_v24 = vsel %vm2122_vm15, %v2117_v38, 0.0  ;;  %vm1893_vm6 = vcmp.eq.f32.partialorder %v1861_v16, inf }
 0x1c9   : > { %v2077_v49 = vmul.f32 %v2656_v58, %v3360_v42  ;;  %v2095_v50 = vsub.f32 1.4, %v2075_v36  ;;  %v2110_v39 = vmul.f32 %v2102_v44, %v2102_v44  ;;  %v2129_v29 = vadd.f32 %v2128_v24, %v2127_v41  ;;  %v3448_v11 = vpop.xlane.xlu1 %1866 }
 0x1ca   : > { %2663 = vrsqrt.f32 %v3448_v11 }
 0x1cb   : > { %v2079_v21 = vsel %vm2078_vm7, %v3360_v42, %v2077_v49  ;;  %v2103_v61 = vmax.f32 %v2095_v50, 0.0  ;;  %v2118_v42 = vsel %vm1817_vm5, %v2110_v39, 0.0  ;;  %v2145_v49 = vld [vmem:[%s2877_s21 + $0x8] sm:$0xff]  ;;  %vm1895_vm7 = vcmp.eq.f32.partialorder %v1861_v16, 0.0 }
 0x1cc   : > { %v2082_v47 = vsel %vm2080_vm8, %v2081_v18, %v2079_v21  ;;  %v2658_v51 = vpop.eup %2657  ;;  %v2130_v7 = vsel %vm2122_vm15, %v2118_v42, 0.0  ;;  %v1882_v21 = vand.u32 2147483648, %v1855_v60  ;;  %v2147_v42 = vld [vmem:[%s2877_s21 + $0x18] sm:$0xff]  ;;  %vm1907_vm8 = vcmp.eq.f32.partialorder %v3448_v11, inf }
 0x1cd   : > { %v2096_v8 = vsub.f32 1.4, %v2082_v47  ;;  %v2084_v52 = vmul.f32 %v2658_v51, %v3384_v53  ;;  %v2111_v40 = vmul.f32 %v2103_v61, %v2103_v61  ;;  %v2131_v19 = vadd.f32 %v2130_v7, %v2129_v29  ;;  %v3454_v5 = vpop.xlane.xlu1 %1872 }
 0x1ce   : > { %v2660_v17 = vpop.eup %2659 }
 0x1cf   : > { %v2104_v59 = vmax.f32 %v2096_v8, 0.0  ;;  %v2086_v9 = vsel %vm2085_vm12, %v3384_v53, %v2084_v52  ;;  %v2119_v30 = vsel %vm1818_vm9, %v2111_v40, 0.0  ;;  %v1878_v48 = vmul.f32 %v2660_v17, %v1855_v60 }
 0x1d0   : > { %v2089_v31 = vsel %vm2087_vm13, %v2088_v45, %v2086_v9  ;;  %v2132_v15 = vsel %vm2122_vm15, %v2119_v30, 0.0  ;;  %v2662_v14 = vpop.eup %2661  ;;  %v1896_v8 = vand.u32 2147483648, %v1861_v16  ;;  %v2148_v30 = vld [vmem:[%s2877_s21 + $0x20] sm:$0xff]  ;;  %vm1909_vm12 = vcmp.eq.f32.partialorder %v3448_v11, 0.0 }
 0x1d1   : > { %v2112_v27 = vmul.f32 %v2104_v59, %v2104_v59  ;;  %v2097_v0 = vsub.f32 1.4, %v2089_v31  ;;  %v2133_v57 = vadd.f32 %v2132_v15, %v2131_v19  ;;  %v1892_v1 = vmul.f32 %v2662_v14, %v1861_v16 }
 0x1d2   : > { %v1880_v47 = vsel %vm1879_vm1, %v1855_v60, %v1878_v48 }
 0x1d3   : > { %v2120_v37 = vsel %vm1819_vm10, %v2112_v27, 0.0  ;;  %v2105_v53 = vmax.f32 %v2097_v0, 0.0  ;;  %v1883_v23 = vsel %vm1881_vm0, %v1882_v21, %v1880_v47  ;;  %v1894_v52 = vsel %vm1893_vm6, %v1861_v16, %v1892_v1 }
 0x1d4   : > { %v2134_v6 = vsel %vm2122_vm15, %v2120_v37, 0.0  ;;  %v2664_v22 = vpop.eup %2663  ;;  %v1933_v45 = vmul.f32 0.5, %v1883_v23  ;;  %v1897_v59 = vsel %vm1895_vm7, %v1896_v8, %v1894_v52  ;;  %v1910_v0 = vand.u32 2147483648, %v3448_v11  ;;  %v2151_v8 = vld [vmem:[%s2877_s21 + $0x38] sm:$0xff] }
 0x1d5   : > { %v2113_v63 = vmul.f32 %v2105_v53, %v2105_v53  ;;  %v2135_v54 = vadd.f32 %v2134_v6, %v2133_v57  ;;  %v1906_v24 = vmul.f32 %v2664_v22, %v3448_v11  ;;  %v1935_v60 = vmul.f32 0.5, %v1897_v59  ;;  %v2149_v57 = vld [vmem:[%s2877_s21 + $0x28] sm:$0xff] }
 0x1d6   : > { %v2565_v37 = vadd.f32 -0.1, %v1933_v45  ;;  %vm1921_vm0 = vcmp.eq.f32.partialorder %v3454_v5, inf  ;;  %vm1923_vm6 = vcmp.eq.f32.partialorder %v3454_v5, 0.0 }
 0x1d7   : > { %v2121_v34 = vsel %vm1820_vm14, %v2113_v63, 0.0  ;;  %v1908_v15 = vsel %vm1907_vm8, %v3448_v11, %v1906_v24 }
 0x1d8   : > { %v2136_v10 = vsel %vm2122_vm15, %v2121_v34, 0.0 }
 0x1d9   : > { %v2137_v43 = vadd.f32 %v2136_v10, %v2135_v54  ;;  %v2567_v10 = vadd.f32 -0.1, %v1935_v60 }
 0x1db   : > { %v2138_v3 = vrot.slane %v2137_v43, 4 }
 0x1dd   : > { %v2139_v32 = vadd.f32 %v2138_v3, %v2137_v43  ;;  %v1911_v43 = vsel %vm1909_vm12, %v1910_v0, %v1908_v15 }
 0x1de   : > { %v1937_v11 = vmul.f32 0.5, %v1911_v43 }
 0x1df   : > { %v2140_v33 = vrot.slane %v2139_v32, 2 }
 0x1e0   : > { %v3495_v22 = vadd.f32 -0.1, %v1937_v11 }
 0x1e1   : > { %v2161_v44 = vpop.xlane.xlu0 %2160  ;;  %v2141_v25 = vadd.f32 %v2140_v33, %v2139_v32  ;;  %v1949_v32 = vmax.f32 %v2565_v37, 0.0 }
 0x1e2   : > { %v2176_v58 = vadd.f32 %v2161_v44, %v2144_v2  ;;  %v1924_v2 = vand.u32 2147483648, %v3454_v5  ;;  %v2150_v44 = vld [vmem:[%s2877_s21 + $0x30] sm:$0xff]  ;;  %v1953_v0 = vmax.f32 %v3495_v22, 0.0 }
 0x1e3   : > { %v2142_v36 = vrot.slane %v2141_v25, 1  ;;  %v3497_v45 = vmul.f32 %v1949_v32, %v1949_v32 }
 0x1e4   : > { %v2184_v35 = vmax.f32 %v2176_v58, 0.0  ;;  %v1961_v62 = vmul.f32 %v1953_v0, %v1953_v0 }
 0x1e5   : > { %v2163_v18 = vpop.xlane.xlu0 %2162  ;;  %v2143_v39 = vadd.f32 %v2142_v36, %v2141_v25 }
 0x1e6   : > { %2665 = vrsqrt.f32 %v2184_v35  ;;  %v2177_v50 = vadd.f32 %v2163_v18, %v2145_v49  ;;  %vm2194_vm13 = vcmp.eq.f32.partialorder %v2184_v35, inf  ;;  %v2197_v19 = vand.u32 2147483648, %v2184_v35 }
 0x1e7   : > { %2303 = vperm.xlu1 %2605, %v2143_v39   ;;  %2667 = vrsqrt.f32 %v3454_v5  ;;  %vm2196_vm1 = vcmp.eq.f32.partialorder %v2184_v35, 0.0  ;;  %v1969_v46 = vsel %vm1817_vm5, %v1961_v62, 0.0 }
 0x1e8   : > { %v2185_v61 = vmax.f32 %v2177_v50, 0.0  ;;  %v1951_v50 = vmax.f32 %v2567_v10, 0.0 }
 0x1e9   : > { %v2165_v38 = vpop.xlane.xlu0 %2164 }
 0x1ea   : > { %v2178_v51 = vadd.f32 %v2165_v38, %v2146_v20  ;;  %2669 = vrsqrt.f32 %v2185_v61  ;;  %vm2201_vm7 = vcmp.eq.f32.partialorder %v2185_v61, inf  ;;  %v2204_v33 = vand.u32 2147483648, %v2185_v61 }
 0x1eb   : > { %vm2203_vm8 = vcmp.eq.f32.partialorder %v2185_v61, 0.0  ;;  %v3501_v59 = vmul.f32 %v1951_v50, %v1951_v50 }
 0x1ec   : > { %v3457_v40 = vmax.f32 %v2178_v51, 0.0 }
 0x1ed   : > { %v2167_v12 = vpop.xlane.xlu0 %2166 }
 0x1ee   : > { %2671 = vrsqrt.f32 %v3457_v40  ;;  %v2179_v9 = vadd.f32 %v2167_v12, %v2147_v42  ;;  %vm2208_vm12 = vcmp.eq.f32.partialorder %v3457_v40, inf  ;;  %v2211_v20 = vand.u32 2147483648, %v3457_v40 }
 0x1f0   : > { %v2666_v41 = vpop.eup %2665  ;;  %v3465_v27 = vmax.f32 %v2179_v9, 0.0 }
 0x1f1   : > { %v2193_v31 = vmul.f32 %v2666_v41, %v2184_v35  ;;  %v2169_v7 = vpop.xlane.xlu0 %2168  ;;  %v2668_v6 = vpop.eup %2667 }
 0x1f2   : > { %v2180_v29 = vadd.f32 %v2169_v7, %v2148_v30  ;;  %2673 = vrsqrt.f32 %v3465_v27  ;;  %v1920_v58 = vmul.f32 %v2668_v6, %v3454_v5  ;;  %v2218_v30 = vand.u32 2147483648, %v3465_v27 }
 0x1f3   : > { %v2195_v53 = vsel %vm2194_vm13, %v2184_v35, %v2193_v31  ;;  %vm2210_vm13 = vcmp.eq.f32.partialorder %v3457_v40, 0.0 }
 0x1f4   : > { %v3470_v63 = vmax.f32 %v2180_v29, 0.0  ;;  %v2670_v16 = vpop.eup %2669  ;;  %v2198_v34 = vsel %vm2196_vm1, %v2197_v19, %v2195_v53  ;;  %v1922_v47 = vsel %vm1921_vm0, %v3454_v5, %v1920_v58  ;;  %vm2215_vm1 = vcmp.eq.f32.partialorder %v3465_v27, inf }
 0x1f5   : > { %v2171_v54 = vpop.xlane.xlu0 %2170  ;;  %v2200_v3 = vmul.f32 %v2670_v16, %v2185_v61  ;;  %v2248_v14 = vsub.f32 1.4, %v2198_v34  ;;  %v1925_v24 = vsel %vm1923_vm6, %v1924_v2, %v1922_v47  ;;  %vm2217_vm0 = vcmp.eq.f32.partialorder %v3465_v27, 0.0 }
 0x1f6   : > { %2675 = vrsqrt.f32 %v3470_v63  ;;  %v2181_v17 = vadd.f32 %v2171_v54, %v2149_v57  ;;  %vm2222_vm6 = vcmp.eq.f32.partialorder %v3470_v63, inf  ;;  %v2225_v6 = vand.u32 2147483648, %v3470_v63 }
 0x1f7   : > { %v2202_v35 = vsel %vm2201_vm7, %v2185_v61, %v2200_v3  ;;  %v2256_v61 = vmax.f32 %v2248_v14, 0.0  ;;  %vm2224_vm7 = vcmp.eq.f32.partialorder %v3470_v63, 0.0  ;;  %v3522_v54 = vmul.f32 0.5, %v1925_v24 }
 0x1f8   : > { %v2672_v25 = vpop.eup %2671  ;;  %v2205_v49 = vsel %vm2203_vm8, %v2204_v33, %v2202_v35  ;;  %v3482_v48 = vmax.f32 %v2181_v17, 0.0 }
 0x1f9   : > { %v2207_v36 = vmul.f32 %v2672_v25, %v3457_v40  ;;  %v2173_v18 = vpop.xlane.xlu0 %2172  ;;  %v2249_v39 = vsub.f32 1.4, %v2205_v49  ;;  %v2264_v7 = vmul.f32 %v2256_v61, %v2256_v61 }
 0x1fa   : > { %v2182_v21 = vadd.f32 %v2173_v18, %v2150_v44  ;;  %2677 = vrsqrt.f32 %v3482_v48  ;;  %vm2229_vm8 = vcmp.eq.f32.partialorder %v3482_v48, inf  ;;  %v2232_v33 = vand.u32 2147483648, %v3482_v48 }
 0x1fb   : > { %v2209_v1 = vsel %vm2208_vm12, %v3457_v40, %v2207_v36  ;;  %v2257_v52 = vmax.f32 %v2249_v39, 0.0  ;;  %vm2231_vm12 = vcmp.eq.f32.partialorder %v3482_v48, 0.0  ;;  %v2272_v3 = vsel %vm1813_vm11, %v2264_v7, 0.0 }
 0x1fc   : > { %v2212_v38 = vsel %vm2210_vm13, %v2211_v20, %v2209_v1  ;;  %v3492_v51 = vmax.f32 %v2182_v21, 0.0  ;;  %v2674_v23 = vpop.eup %2673  ;;  %v2280_v11 = vsel %vm2122_vm15, %v2272_v3, 0.0 }
 0x1fd   : > { %v2250_v42 = vsub.f32 1.4, %v2212_v38  ;;  %v2175_v12 = vpop.xlane.xlu0 %2174  ;;  %v2214_v40 = vmul.f32 %v2674_v23, %v3465_v27  ;;  %v2265_v29 = vmul.f32 %v2257_v52, %v2257_v52 }
 0x1fe   : > { %2679 = vrsqrt.f32 %v3492_v51  ;;  %v2183_v41 = vadd.f32 %v2175_v12, %v2151_v8  ;;  %vm2236_vm13 = vcmp.eq.f32.partialorder %v3492_v51, inf  ;;  %v2239_v17 = vand.u32 2147483648, %v3492_v51 }
 0x1ff   : > { %v2258_v9 = vmax.f32 %v2250_v42, 0.0  ;;  %v2216_v60 = vsel %vm2215_vm1, %v3465_v27, %v2214_v40  ;;  %v2273_v32 = vsel %vm1814_vm2, %v2265_v29, 0.0  ;;  %vm2238_vm1 = vcmp.eq.f32.partialorder %v3492_v51, 0.0 }
 0x200   : > { %v2676_v31 = vpop.eup %2675  ;;  %v2219_v37 = vsel %vm2217_vm0, %v2218_v30, %v2216_v60  ;;  %v3511_v5 = vmax.f32 %v2183_v41, 0.0  ;;  %v2281_v49 = vsel %vm2122_vm15, %v2273_v32, 0.0 }
 0x201   : > { %v2221_v15 = vmul.f32 %v2676_v31, %v3470_v63  ;;  %v3513_v53 = vpop.xlane.xlu0 %1857  ;;  %v2251_v19 = vsub.f32 1.4, %v2219_v37  ;;  %v2266_v57 = vmul.f32 %v2258_v9, %v2258_v9 }
 0x202   : > { %2681 = vrsqrt.f32 %v3513_v53  ;;  %vm2243_vm0 = vcmp.eq.f32.partialorder %v3511_v5, inf  ;;  %v2246_v47 = vand.u32 2147483648, %v3511_v5  ;;  %v1889_v52 = vand.u32 2147483648, %v3513_v53 }
 0x203   : > { %v2223_v27 = vsel %vm2222_vm6, %v3470_v63, %v2221_v15  ;;  %2683 = vrsqrt.f32 %v3511_v5  ;;  %v2259_v16 = vmax.f32 %v2251_v19, 0.0  ;;  %v2274_v58 = vsel %vm1815_vm3, %v2266_v57, 0.0 }
 0x204   : > { %v2226_v34 = vsel %vm2224_vm7, %v2225_v6, %v2223_v27  ;;  %v2678_v10 = vpop.eup %2677  ;;  %vm1886_vm6 = vcmp.eq.f32.partialorder %v3513_v53, inf  ;;  %v2283_v21 = vsel %vm2122_vm15, %v2274_v58, 0.0  ;;  %vm2245_vm7 = vcmp.eq.f32.partialorder %v3511_v5, 0.0 }
 0x205   : > { %v2252_v43 = vsub.f32 1.4, %v2226_v34  ;;  %v3529_v2 = vpop.xlane.xlu0 %1863  ;;  %v2228_v63 = vmul.f32 %v2678_v10, %v3482_v48  ;;  %v2267_v35 = vmul.f32 %v2259_v16, %v2259_v16 }
 0x206   : > { %2685 = vrsqrt.f32 %v3529_v2  ;;  %v1903_v19 = vand.u32 2147483648, %v3529_v2 }
 0x207   : > { %v2260_v44 = vmax.f32 %v2252_v43, 0.0  ;;  %v2230_v14 = vsel %vm2229_vm8, %v3482_v48, %v2228_v63  ;;  %v2282_v48 = vadd.f32 %v2281_v49, %v2280_v11  ;;  %v2275_v23 = vsel %vm1816_vm4, %v2267_v35, 0.0 }
 0x208   : > { %v2680_v25 = vpop.eup %2679  ;;  %v2233_v18 = vsel %vm2231_vm12, %v2232_v33, %v2230_v14  ;;  %vm1888_vm8 = vcmp.eq.f32.partialorder %v3513_v53, 0.0  ;;  %vm1900_vm12 = vcmp.eq.f32.partialorder %v3529_v2, inf  ;;  %v2285_v31 = vsel %vm2122_vm15, %v2275_v23, 0.0 }
 0x209   : > { %v2235_v36 = vmul.f32 %v2680_v25, %v3492_v51  ;;  %v3549_v50 = vpop.xlane.xlu0 %1869  ;;  %v2253_v39 = vsub.f32 1.4, %v2233_v18  ;;  %v2268_v20 = vmul.f32 %v2260_v44, %v2260_v44  ;;  %v2284_v40 = vadd.f32 %v2283_v21, %v2282_v48 }
 0x20a   : > { %2687 = vrsqrt.f32 %v3549_v50  ;;  %v1917_v44 = vand.u32 2147483648, %v3549_v50  ;;  %v2571_v18 = vadd.f32 -0.1, %v3522_v54  ;;  %v1967_v21 = vsel %vm1815_vm3, %v3501_v59, 0.0 }
 0x20b   : > { %v2237_v1 = vsel %vm2236_vm13, %v3492_v51, %v2235_v36  ;;  %v2261_v8 = vmax.f32 %v2253_v39, 0.0  ;;  %v2276_v51 = vsel %vm1817_vm5, %v2268_v20, 0.0  ;;  %vm1902_vm13 = vcmp.eq.f32.partialorder %v3529_v2, 0.0 }
 0x20c   : > { %v2682_v61 = vpop.eup %2681  ;;  %v2240_v38 = vsel %vm2238_vm1, %v2239_v17, %v2237_v1  ;;  %v2287_v27 = vsel %vm2122_vm15, %v2276_v51, 0.0  ;;  %v2286_v34 = vadd.f32 %v2285_v31, %v2284_v40  ;;  %vm1914_vm1 = vcmp.eq.f32.partialorder %v3549_v50, inf }
 0x20d   : > { %v2684_v42 = vpop.eup %2683  ;;  %v2254_v12 = vsub.f32 1.4, %v2240_v38  ;;  %v1885_v24 = vmul.f32 %v2682_v61, %v3513_v53  ;;  %v2269_v30 = vmul.f32 %v2261_v8, %v2261_v8  ;;  %v1965_v39 = vsel %vm1813_vm11, %v3497_v45, 0.0 }
 0x20e   : > { %v2242_v9 = vmul.f32 %v2684_v42, %v3511_v5  ;;  %v2288_v33 = vadd.f32 %v2287_v27, %v2286_v34  ;;  %v1955_v23 = vmax.f32 %v2571_v18, 0.0  ;;  %vm2313_vm3 = vcmask 1041408  }
 0x20f   : > { %v2262_v41 = vmax.f32 %v2254_v12, 0.0  ;;  %v1887_v7 = vsel %vm1886_vm6, %v3513_v53, %v1885_v24  ;;  %v2277_v37 = vsel %vm1818_vm9, %v2269_v30, 0.0 }
 0x210   : > { %v2686_v60 = vpop.eup %2685  ;;  %v2244_v29 = vsel %vm2243_vm0, %v3511_v5, %v2242_v9  ;;  %v1890_v15 = vsel %vm1888_vm8, %v1889_v52, %v1887_v7  ;;  %v2289_v3 = vsel %vm2122_vm15, %v2277_v37, 0.0  ;;  %vm1916_vm0 = vcmp.eq.f32.partialorder %v3549_v50, 0.0 }
 0x211   : > { %v2247_v6 = vsel %vm2245_vm7, %v2246_v47, %v2244_v29  ;;  %v2270_v57 = vmul.f32 %v2262_v41, %v2262_v41  ;;  %v1934_v53 = vmul.f32 0.5, %v1890_v15  ;;  %v1899_v10 = vmul.f32 %v2686_v60, %v3529_v2 }
 0x212   : > { %v2255_v16 = vsub.f32 1.4, %v2247_v6  ;;  %v2290_v49 = vadd.f32 %v2289_v3, %v2288_v33  ;;  %v1963_v22 = vmul.f32 %v1955_v23, %v1955_v23 }
 0x213   : > { %v2278_v43 = vsel %vm1819_vm10, %v2270_v57, 0.0  ;;  %v2566_v32 = vadd.f32 -0.1, %v1934_v53  ;;  %v1901_v17 = vsel %vm1900_vm12, %v3529_v2, %v1899_v10 }
 0x214   : > { %v2688_v5 = vpop.eup %2687  ;;  %v2263_v63 = vmax.f32 %v2255_v16, 0.0  ;;  %v2291_v58 = vsel %vm2122_vm15, %v2278_v43, 0.0  ;;  %v1904_v14 = vsel %vm1902_vm13, %v1903_v19, %v1901_v17  ;;  %v1971_v60 = vsel %vm1819_vm10, %v1963_v22, 0.0  ;;  %v1876_v19 = vpop.xlane.xlu0 %1875 }
 0x215   : > { %v1950_v25 = vmax.f32 %v2566_v32, 0.0  ;;  %v1913_v35 = vmul.f32 %v2688_v5, %v3549_v50  ;;  %v1936_v36 = vmul.f32 0.5, %v1904_v14  ;;  %v2292_v47 = vadd.f32 %v2291_v58, %v2290_v49 }
 0x216   : > { %v2271_v11 = vmul.f32 %v2263_v63, %v2263_v63  ;;  %2689 = vrsqrt.f32 %v1876_v19  ;;  %vm1928_vm11 = vcmp.eq.f32.partialorder %v1876_v19, inf  ;;  %v1931_v57 = vand.u32 2147483648, %v1876_v19 }
 0x217   : > { %v1958_v20 = vmul.f32 %v1950_v25, %v1950_v25  ;;  %v1915_v2 = vsel %vm1914_vm1, %v3549_v50, %v1913_v35  ;;  %v2568_v48 = vadd.f32 -0.1, %v1936_v36 }
 0x218   : > { %v2279_v1 = vsel %vm1820_vm14, %v2271_v11, 0.0  ;;  %v1918_v54 = vsel %vm1916_vm0, %v1917_v44, %v1915_v2 }
 0x219   : > { %v2293_v13 = vsel %vm2122_vm15, %v2279_v1, 0.0  ;;  %v1966_v45 = vsel %vm1814_vm2, %v1958_v20, 0.0  ;;  %v1938_v59 = vmul.f32 0.5, %v1918_v54  ;;  %v1952_v8 = vmax.f32 %v2568_v48, 0.0 }
 0x21a   : > { %v2294_v61 = vadd.f32 %v2293_v13, %v2292_v47  ;;  %v1973_v38 = vadd.f32 %v1966_v45, %v1965_v39  ;;  %vm1930_vm15 = vcmp.eq.f32.partialorder %v1876_v19, 0.0  ;;  %vm2311_vm2 = vcmask 1040384  }
 0x21b   : > { %v2570_v52 = vadd.f32 -0.1, %v1938_v59  ;;  %v1960_v40 = vmul.f32 %v1952_v8, %v1952_v8 }
 0x21c   : > { %v2295_v42 = vrot.slane %v2294_v61, 4  ;;  %v1974_v12 = vadd.f32 %v1973_v38, %v1967_v21 }
 0x21d   : > { %v1954_v50 = vmax.f32 %v2570_v52, 0.0  ;;  %v1968_v9 = vsel %vm1816_vm4, %v1960_v40, 0.0 }
 0x21e   : > { %v2296_v24 = vadd.f32 %v2295_v42, %v2294_v61  ;;  %v1975_v30 = vadd.f32 %v1974_v12, %v1968_v9 }
 0x21f   : > { %v1962_v0 = vmul.f32 %v1954_v50, %v1954_v50 }
 0x220   : > { %v2297_v51 = vrot.slane %v2296_v24, 2  ;;  %v1976_v31 = vadd.f32 %v1975_v30, %v1969_v46  ;;  %v2690_v26 = vpop.eup %2689 }
 0x221   : > { %v1970_v41 = vsel %vm1818_vm9, %v1962_v0, 0.0  ;;  %v1927_v6 = vmul.f32 %v2690_v26, %v1876_v19 }
 0x222   : > { %v2298_v7 = vadd.f32 %v2297_v51, %v2296_v24  ;;  %v1977_v29 = vadd.f32 %v1976_v31, %v1970_v41 }
 0x223   : > { %v1929_v28 = vsel %vm1928_vm11, %v1876_v19, %v1927_v6 }
 0x224   : > { %v2299_v37 = vrot.slane %v2298_v7, 1  ;;  %v1978_v15 = vadd.f32 %v1977_v29, %v1971_v60  ;;  %v1932_v27 = vsel %vm1930_vm15, %v1931_v57, %v1929_v28 }
 0x225   : > { %v1940_v53 = vmul.f32 0.5, %v1932_v27 }
 0x226   : > { %v2300_v55 = vadd.f32 %v2299_v37, %v2298_v7 }
 0x227   : > { %v2572_v16 = vadd.f32 -0.1, %v1940_v53 }
 0x228   : > { %2308 = vperm.xlu0 %2606, %v2300_v55  }
 0x229   : > { %v1956_v56 = vmax.f32 %v2572_v16, 0.0 }
 0x22b   : > { %v1964_v34 = vmul.f32 %v1956_v56, %v1956_v56 }
 0x22d   : > { %v1972_v10 = vsel %vm1820_vm14, %v1964_v34, 0.0 }
 0x22e   : > { %v1979_v43 = vadd.f32 %v1978_v15, %v1972_v10 }
 0x230   : > { %v1980_v3 = vrot.slane %v1979_v43, 4 }
 0x232   : > { %v1981_v32 = vadd.f32 %v1980_v3, %v1979_v43 }
 0x234   : > { %v1982_v5 = vrot.slane %v1981_v32, 2 }
 0x236   : > { %v1983_v63 = vadd.f32 %v1982_v5, %v1981_v32 }
 0x238   : > { %v1984_v33 = vrot.slane %v1983_v63, 1 }
 0x23a   : > { %v1985_v17 = vadd.f32 %v1984_v33, %v1983_v63 }
 0x266   : > { %v2304_v44 = vpop.permute.xlu1 %2303 }
 0x267   : > { %v2312_v58 = vsel %vm2311_vm2, %v1985_v17, %v2304_v44 }
 0x2a7   : > { %v2309_v4 = vpop.permute.xlu0 %2308 }
 0x2a8   : > { %v2314_v25 = vsel %vm2313_vm3, %v2312_v58, %v2309_v4 }
 0x2a9   : > { %2315 = vst [vmem:[%s471_s25] sm:$0x7] %v2314_v25 }
 0x2aa PF: > { %s18_s29 = sadd.s32 1, %s2713_s29   ;;  %s3650_s27 = smov %s2709_s28 }
 0x2ab   : > { %p15_p6 = scmp.ge.s32.totalorder %s18_s29, 4   ;;  %s3651_s28 = smov %s3653_s30 }
 0x2ad   :  { %17 = sbr.rel (!%p15_p6) target bundleno = 2 (0x2), region = 111 }

</bundles_post_ra>
